<compile_context>
chip_gen: v6e
topology: v6e:2x2x1
jax: 0.10.0
libtpu: 0.0.40
codegen_flags: <defaults>
</compile_context>

<pallas_src>
import jax
import jax.numpy as jnp
import numpy as np
from jax import lax
from jax.experimental import pallas as pl
from jax.experimental.pallas import tpu as pltpu

DISCRIMINATOR_DIM = 64
HORIZON = 24
XDIM = 4
KSIZE = 5          # Conv1d kernel size (padding = 2, "same")
N_GROUPS = 8       # GroupNorm groups
INITS_EMB_DIM = 4
EPS = 1e-5
MAX_BATCH_TILE = 128


# ----------------------------------------------------------------------------
# Pallas kernel: whole Discriminator forward for one batch tile of TB samples
# ----------------------------------------------------------------------------
def _disc_kernel(xc_ref, i_ref,
                 wcomb_ref, cw_ref, w2_ref, vec_ref,
                 gmat2_ref, gmatT2_ref, wfc_ref,
                 o_ref):
    TB, H, KC = xc_ref.shape
    D = w2_ref.shape[1]
    NG = gmatT2_ref.shape[0] // 2
    grp = D // NG
    pad = KSIZE // 2
    f32 = jnp.float32

    # packed small vectors: one (8, 2D) lane-dense tile
    vec = vec_ref[...]                      # (8, 2D)
    bias1 = vec[0:1, :]                     # (1, 2D) = [b1 | bres]
    g1, g2 = vec[1:2, :D], vec[1:2, D:]
    be1, be2 = vec[2:3, :D], vec[2:3, D:]
    cb, b2 = vec[3:4, :D], vec[3:4, D:]
    bfc = vec[4:5, 0:1]                     # (1, 1)

    def mish(v):
        # x * tanh(softplus(x)) == x * e(e+2) / (e(e+2) + 2),  e = exp(x).
        # clamp at 20: beyond that the ratio is exactly 1.0 in f32.
        e = jnp.exp(jnp.minimum(v, 20.0))
        num = e * (e + 2.0)
        return v * num * pl.reciprocal(num + 2.0, approx=True)

    def groupnorm(h3, gamma, beta):
        # h3: (TB, H, D); per-sample, per-group stats over (H, channels-in-group)
        n = float(H * grp)
        s = jnp.sum(h3, axis=1)                                   # (TB, D)
        ss = jnp.sum(h3 * h3, axis=1)                             # (TB, D)
        # fused: one (TB, 2D) x (2D, 2NG) dot gives both group sums
        g = jnp.dot(jnp.concatenate([s, ss], axis=-1), gmat2_ref[...],
                    preferred_element_type=f32)                   # (TB, 2NG)
        mean = g[:, :NG] / n
        var = jnp.maximum(g[:, NG:] / n - mean * mean, 0.0)
        # fused: one (TB, 2NG) x (2NG, 2D) dot maps mean & rsqrt back to channels
        c = jnp.dot(jnp.concatenate([mean, lax.rsqrt(var + EPS)], axis=-1),
                    gmatT2_ref[...], preferred_element_type=f32)  # (TB, 2D)
        mean_c = c[:, :D][:, None, :]
        inv_c = c[:, D:][:, None, :]
        return (h3 - mean_c) * inv_c * gamma + beta

    # ---- fused block-1 conv (XDIM->D, k=5) + residual 1x1 conv: ONE bf16
    #      im2col matmul with N = 2D = 128 lane-dense columns.
    fused = jnp.dot(xc_ref[...].reshape(TB * H, KC), wcomb_ref[...],
                    preferred_element_type=f32) + bias1           # (TB*H, 2D)
    h = fused[:, :D].reshape(TB, H, D)
    res = fused[:, D:].reshape(TB, H, D)
    h = mish(groupnorm(h, g1, be1))

    # ---- conditioning from inits_emb: Mish -> Linear -> per-channel bias
    cond = jnp.dot(mish(i_ref[...]), cw_ref[...],
                   preferred_element_type=f32) + cb               # (TB, D)
    h = h + cond[:, None, :]

    # ---- block 2: Conv1d(D->D, k=5, pad=2) as ONE im2col matmul.
    #      in-register im2col: XLU sublane rolls + boundary masks (no scratch,
    #      no sublane-misaligned VMEM round trip).
    t_idx = lax.broadcasted_iota(jnp.int32, (H, D), 0)
    taps = []
    for k in range(KSIZE):
        if k == pad:
            taps.append(h)
            continue
        rolled = pltpu.roll(h, shift=(pad - k) % H, axis=1)
        lo = max(0, pad - k)
        hi = min(H, H + pad - k)
        mask = (t_idx >= lo) & (t_idx < hi)                       # (H, D)
        taps.append(jnp.where(mask, rolled, 0.0))
    cols2 = jnp.concatenate(taps, axis=-1).reshape(TB * H, KSIZE * D)

    h2 = jnp.dot(cols2.astype(jnp.bfloat16), w2_ref[...],
                 preferred_element_type=f32) + b2                 # (TB*H, D)
    h2 = mish(groupnorm(h2.reshape(TB, H, D), g2, be2))

    out = h2 + res

    # ---- flatten + fc(D*H -> 1); wfc is pre-laid-out as (H, D).
    #      one lane-dense (TB, 128) store instead of TB masked (1,1) stores.
    row = jnp.sum(out * wfc_ref[...][None, :, :], axis=-1)        # (TB, H)
    vals = jnp.sum(row, axis=-1, keepdims=True) + bfc             # (TB, 1)
    o_ref[...] = jnp.broadcast_to(vals, (TB, o_ref.shape[1]))


# ----------------------------------------------------------------------------
# Wrapper (layout transpose, im2col, weight fusion/packing, batch tiling)
# ----------------------------------------------------------------------------
@jax.jit
def discriminator_forward(x, inits, params):
    """x: (B, XDIM, HORIZON) float32 (PyTorch NCL); inits: (B, INITS_EMB_DIM)."""
    B, Cin, H = x.shape
    K = KSIZE
    D = params["w1"].shape[2]
    E = inits.shape[1]
    pad = K // 2
    f32 = jnp.float32

    # batch tiling: fold as many samples as possible into the matmul M dim;
    # only split the grid (>= 2 "parallel" steps -> shards across TCs on
    # dual-TC chips) when each tile still has a decent M.  On single-TC chips
    # the extra step is ~0.35 us, negligible.
    ntiles = pl.cdiv(B, MAX_BATCH_TILE)
    if ntiles == 1 and B >= 64:
        ntiles = 2
    if ntiles > 1:
        TB = ((pl.cdiv(B, ntiles) + 7) // 8) * 8   # multiple of 8 (2D block dims)
    else:
        TB = B
    Bp = ntiles * TB

    xt = jnp.transpose(x, (0, 2, 1)).astype(f32)                  # (B, H, Cin)
    it = inits.astype(f32)
    if Bp != B:
        xt = jnp.pad(xt, ((0, Bp - B), (0, 0), (0, 0)))
        it = jnp.pad(it, ((0, Bp - B), (0, 0)))

    # im2col of the zero-padded input for the first conv (pure XLA, cheap)
    xp = jnp.pad(xt, ((0, 0), (pad, pad), (0, 0)))                # (Bp, H+4, Cin)
    xcols = jnp.concatenate([xp[:, k:k + H, :] for k in range(K)],
                            axis=-1).astype(jnp.bfloat16)         # (Bp, H, 5*Cin)

    # fused conv-1 + residual weight: (5*Cin, 2D), bf16.  wres lives at the
    # center-tap rows so xcols @ [w1f | wres_center] == [conv1(x) | x @ wres].
    w1f = params["w1"].reshape(K * Cin, D)
    wres_full = jnp.zeros((K * Cin, D), f32).at[pad * Cin:(pad + 1) * Cin, :].set(
        params["wres"])
    wcomb = jnp.concatenate([w1f, wres_full], axis=-1).astype(jnp.bfloat16)
    w2b = params["w2"].reshape(K * D, D).astype(jnp.bfloat16)     # (5D, D) bf16

    # packed small vectors: one (8, 2D) lane-dense array instead of 9 tiny DMAs
    vec = jnp.zeros((8, 2 * D), f32)
    vec = vec.at[0, :].set(jnp.concatenate([params["b1"][0], params["bres"][0]]))
    vec = vec.at[1, :].set(jnp.concatenate([params["g1"][0], params["g2"][0]]))
    vec = vec.at[2, :].set(jnp.concatenate([params["be1"][0], params["be2"][0]]))
    vec = vec.at[3, :].set(jnp.concatenate([params["cb"][0], params["b2"][0]]))
    vec = vec.at[4, 0].set(params["bfc"][0, 0])

    # block-diagonal group matrices for the fused groupnorm dots
    eye2 = jnp.eye(2, dtype=f32)
    gmat2 = jnp.kron(eye2, params["gmat"])                        # (2D, 2NG)
    gmatT2 = jnp.kron(eye2, params["gmatT"])                      # (2NG, 2D)

    weights = (wcomb, params["cw"], w2b, vec, gmat2, gmatT2, params["wfc"])

    in_specs = ([pl.BlockSpec((TB, H, K * Cin), lambda i: (i, 0, 0)),
                 pl.BlockSpec((TB, E), lambda i: (i, 0))]
                + [pl.BlockSpec(w.shape, lambda i, nd=w.ndim: (0,) * nd)
                   for w in weights])

    out = pl.pallas_call(
        _disc_kernel,
        out_shape=jax.ShapeDtypeStruct((Bp, 128), jnp.float32),
        grid=(ntiles,),
        in_specs=in_specs,
        out_specs=pl.BlockSpec((TB, 128), lambda i: (i, 0)),
        compiler_params=pltpu.CompilerParams(
            dimension_semantics=("parallel",)),
    )(xcols, it, *weights)
    return out[:B, 0]   # matches .squeeze(1) -> (B,)


# ----------------------------------------------------------------------------
# Deterministic parameter construction (synthetic init, no checkpoints)
# ----------------------------------------------------------------------------
def make_params(key, cin=XDIM, d=DISCRIMINATOR_DIM, h=HORIZON, e=INITS_EMB_DIM):
    ks = jax.random.split(key, 8)
    f32 = jnp.float32
    # Conv1d weights stored as (K, Cin, D): w[k, i, o] == torch_w[o, i, k]
    w1 = 0.1 * jax.random.normal(ks[0], (KSIZE, cin, d), f32)
    b1 = 0.05 * jax.random.normal(ks[1], (1, d), f32)
    w2 = 0.05 * jax.random.normal(ks[2], (KSIZE, d, d), f32)
    b2 = 0.05 * jax.random.normal(ks[3], (1, d), f32)
    cw = 0.1 * jax.random.normal(ks[4], (e, d), f32)
    cb = 0.05 * jax.random.normal(ks[5], (1, d), f32)
    wres = 0.1 * jax.random.normal(ks[6], (cin, d), f32)
    bres = jnp.zeros((1, d), f32)
    g1 = jnp.ones((1, d), f32)
    be1 = jnp.zeros((1, d), f32)
    g2 = jnp.ones((1, d), f32)
    be2 = jnp.zeros((1, d), f32)
    # GroupNorm group-indicator matrix (D, NG) and its transpose
    gmat = (jnp.arange(d)[:, None] // (d // N_GROUPS)
            == jnp.arange(N_GROUPS)[None, :]).astype(f32)
    gmatT = gmat.T
    # fc: torch weight (1, D*H) over flatten of (B, D, H) -> index d*H + t.
    # Store as (H, D): wfc[t, d] = torch_wfc[0, d*H + t].
    wfc_torch = 0.02 * jax.random.normal(ks[7], (1, d * h), f32)
    wfc = wfc_torch.reshape(d, h).T
    bfc = jnp.full((1, 1), 0.01, f32)
    return dict(w1=w1, b1=b1, g1=g1, be1=be1, cw=cw, cb=cb,
                w2=w2, b2=b2, g2=g2, be2=be2, wres=wres, bres=bres,
                gmat=gmat, gmatT=gmatT, wfc=wfc, bfc=bfc)


# ----------------------------------------------------------------------------
# Pure-JAX reference (faithful f32 math, channels-last) for validation
# ----------------------------------------------------------------------------
def reference_forward(x, inits, p):
    xt = jnp.transpose(x, (0, 2, 1))
    B, H, _ = xt.shape
    pad = KSIZE // 2
    xp = jnp.pad(xt, ((0, 0), (pad, pad), (0, 0)))

    def mish(v):
        return v * jnp.tanh(jax.nn.softplus(v))

    def gn(h, gamma, beta):
        b, hh, d = h.shape
        hg = h.reshape(b, hh, N_GROUPS, d // N_GROUPS)
        mean = hg.mean(axis=(1, 3), keepdims=True)
        var = ((hg - mean) ** 2).mean(axis=(1, 3), keepdims=True)
        hn = ((hg - mean) / jnp.sqrt(var + EPS)).reshape(b, hh, d)
        return hn * gamma + beta

    h = sum(jnp.einsum("bhc,cd->bhd", xp[:, k:k + H, :], p["w1"][k])
            for k in range(KSIZE)) + p["b1"]
    h = mish(gn(h, p["g1"], p["be1"]))
    cond = jnp.dot(mish(inits), p["cw"]) + p["cb"]
    h = h + cond[:, None, :]
    hp = jnp.pad(h, ((0, 0), (pad, pad), (0, 0)))
    h2 = sum(jnp.einsum("bhc,cd->bhd", hp[:, k:k + H, :], p["w2"][k])
             for k in range(KSIZE)) + p["b2"]
    h2 = mish(gn(h2, p["g2"], p["be2"]))
    res = jnp.einsum("bhc,cd->bhd", xt, p["wres"]) + p["bres"]
    out = h2 + res
    return jnp.sum(out * p["wfc"][None], axis=(1, 2)) + p["bfc"][0, 0]


if __name__ == "__main__":
    key = jax.random.PRNGKey(0)
    kx, ki, kp = jax.random.split(key, 3)

    B = 2
    x = jax.random.normal(kx, (B, XDIM, HORIZON), jnp.float32)       # NCL
    inits = jax.random.normal(ki, (B, INITS_EMB_DIM), jnp.float32)
    params = make_params(kp)

    y = discriminator_forward(x, inits, params)
    y = jax.block_until_ready(y)

    y_ref = reference_forward(x, inits, params)
    # tolerance covers bf16 matmul operands (f32 accumulation) and the
    # approximate EUP reciprocal used in the fast mish
    np.testing.assert_allclose(np.asarray(y), np.asarray(y_ref),
                               rtol=2e-2, atol=2e-2)
    assert y.shape == (B,)
    print("KERNEL_OK")
</pallas_src>

<mosaic_0001>
module attributes {stable_mosaic.version = 11 : i64} {
  func.func @_disc_kernel(%arg0: i32, %arg1: memref<2x24x20xbf16, #tpu.memory_space<vmem>>, %arg2: memref<2x4xf32, #tpu.memory_space<vmem>>, %arg3: memref<20x128xbf16, #tpu.memory_space<vmem>>, %arg4: memref<4x64xf32, #tpu.memory_space<vmem>>, %arg5: memref<320x64xbf16, #tpu.memory_space<vmem>>, %arg6: memref<8x128xf32, #tpu.memory_space<vmem>>, %arg7: memref<128x16xf32, #tpu.memory_space<vmem>>, %arg8: memref<16x128xf32, #tpu.memory_space<vmem>>, %arg9: memref<24x64xf32, #tpu.memory_space<vmem>>, %arg10: memref<2x128xf32, #tpu.memory_space<vmem>>) attributes {dimension_semantics = [#tpu.dimension_semantics<parallel>], iteration_bounds = array<i64: 1>, scalar_prefetch = 0 : i64, scratch_operands = 0 : i64, tpu.core_type = #tpu.core_type<tc>, window_params = [{transform_indices = @transform_0, window_bounds = array<i64: 2, 24, 20>}, {transform_indices = @transform_1, window_bounds = array<i64: 2, 4>}, {pipeline_mode = #tpu.pipeline_mode<synchronous>, transform_indices = @transform_2, window_bounds = array<i64: 20, 128>}, {pipeline_mode = #tpu.pipeline_mode<synchronous>, transform_indices = @transform_3, window_bounds = array<i64: 4, 64>}, {pipeline_mode = #tpu.pipeline_mode<synchronous>, transform_indices = @transform_4, window_bounds = array<i64: 320, 64>}, {pipeline_mode = #tpu.pipeline_mode<synchronous>, transform_indices = @transform_5, window_bounds = array<i64: 8, 128>}, {pipeline_mode = #tpu.pipeline_mode<synchronous>, transform_indices = @transform_6, window_bounds = array<i64: 128, 16>}, {pipeline_mode = #tpu.pipeline_mode<synchronous>, transform_indices = @transform_7, window_bounds = array<i64: 16, 128>}, {pipeline_mode = #tpu.pipeline_mode<synchronous>, transform_indices = @transform_8, window_bounds = array<i64: 24, 64>}, {transform_indices = @transform_9, window_bounds = array<i64: 2, 128>}]} {
    %c0 = arith.constant 0 : index
    %c0_0 = arith.constant 0 : index
    %0 = vector.load %arg6[%c0, %c0_0] : memref<8x128xf32, #tpu.memory_space<vmem>>, vector<8x128xf32>
    %1 = vector.extract_strided_slice %0 {offsets = [0, 0], sizes = [1, 128], strides = [1, 1]} : vector<8x128xf32> to vector<1x128xf32>
    %2 = vector.extract_strided_slice %0 {offsets = [1, 0], sizes = [1, 64], strides = [1, 1]} : vector<8x128xf32> to vector<1x64xf32>
    %3 = vector.extract_strided_slice %0 {offsets = [1, 64], sizes = [1, 64], strides = [1, 1]} : vector<8x128xf32> to vector<1x64xf32>
    %4 = vector.extract_strided_slice %0 {offsets = [2, 0], sizes = [1, 64], strides = [1, 1]} : vector<8x128xf32> to vector<1x64xf32>
    %5 = vector.extract_strided_slice %0 {offsets = [2, 64], sizes = [1, 64], strides = [1, 1]} : vector<8x128xf32> to vector<1x64xf32>
    %6 = vector.extract_strided_slice %0 {offsets = [3, 0], sizes = [1, 64], strides = [1, 1]} : vector<8x128xf32> to vector<1x64xf32>
    %7 = vector.extract_strided_slice %0 {offsets = [3, 64], sizes = [1, 64], strides = [1, 1]} : vector<8x128xf32> to vector<1x64xf32>
    %8 = vector.extract_strided_slice %0 {offsets = [4, 0], sizes = [1, 1], strides = [1, 1]} : vector<8x128xf32> to vector<1x1xf32>
    %c0_1 = arith.constant 0 : index
    %c0_2 = arith.constant 0 : index
    %c0_3 = arith.constant 0 : index
    %9 = vector.load %arg1[%c0_1, %c0_2, %c0_3] : memref<2x24x20xbf16, #tpu.memory_space<vmem>>, vector<2x24x20xbf16>
    %10 = vector.shape_cast %9 : vector<2x24x20xbf16> to vector<48x20xbf16>
    %c0_4 = arith.constant 0 : index
    %c0_5 = arith.constant 0 : index
    %11 = vector.load %arg3[%c0_4, %c0_5] : memref<20x128xbf16, #tpu.memory_space<vmem>>, vector<20x128xbf16>
    %cst = arith.constant dense<0.000000e+00> : vector<48x128xf32>
    %12 = tpu.matmul %10, %11, %cst {dimension_numbers = #tpu.dot_dimension_numbers<[1], [0], [0], [1], [0, 0, 1, 1], [], []>} : vector<48x20xbf16>, vector<20x128xbf16>, vector<48x128xf32> -> vector<48x128xf32>
    %13 = vector.broadcast %1 : vector<1x128xf32> to vector<48x128xf32>
    %14 = arith.addf %12, %13 : vector<48x128xf32>
    %15 = vector.extract_strided_slice %14 {offsets = [0, 0], sizes = [48, 64], strides = [1, 1]} : vector<48x128xf32> to vector<48x64xf32>
    %16 = vector.shape_cast %15 : vector<48x64xf32> to vector<2x24x64xf32>
    %17 = vector.extract_strided_slice %14 {offsets = [0, 64], sizes = [48, 64], strides = [1, 1]} : vector<48x128xf32> to vector<48x64xf32>
    %18 = vector.shape_cast %17 : vector<48x64xf32> to vector<2x24x64xf32>
    %cst_6 = arith.constant dense<0.000000e+00> : vector<2x64xf32>
    %19 = vector.multi_reduction <add>, %16, %cst_6 [1] : vector<2x24x64xf32> to vector<2x64xf32>
    %20 = arith.mulf %16, %16 : vector<2x24x64xf32>
    %cst_7 = arith.constant dense<0.000000e+00> : vector<2x64xf32>
    %21 = vector.multi_reduction <add>, %20, %cst_7 [1] : vector<2x24x64xf32> to vector<2x64xf32>
    %22 = tpu.concatenate %19, %21 in 1 : vector<2x64xf32>, vector<2x64xf32> -> vector<2x128xf32>
    %c0_8 = arith.constant 0 : index
    %c0_9 = arith.constant 0 : index
    %23 = vector.load %arg7[%c0_8, %c0_9] : memref<128x16xf32, #tpu.memory_space<vmem>>, vector<128x16xf32>
    %cst_10 = arith.constant dense<0.000000e+00> : vector<2x16xf32>
    %24 = tpu.matmul %22, %23, %cst_10 {dimension_numbers = #tpu.dot_dimension_numbers<[1], [0], [0], [1], [0, 0, 1, 1], [], []>} : vector<2x128xf32>, vector<128x16xf32>, vector<2x16xf32> -> vector<2x16xf32>
    %25 = vector.extract_strided_slice %24 {offsets = [0, 0], sizes = [2, 8], strides = [1, 1]} : vector<2x16xf32> to vector<2x8xf32>
    %cst_11 = arith.constant 1.920000e+02 : f32
    %26 = vector.broadcast %cst_11 : f32 to vector<2x8xf32>
    %27 = arith.divf %25, %26 : vector<2x8xf32>
    %28 = vector.extract_strided_slice %24 {offsets = [0, 8], sizes = [2, 8], strides = [1, 1]} : vector<2x16xf32> to vector<2x8xf32>
    %cst_12 = arith.constant 1.920000e+02 : f32
    %29 = vector.broadcast %cst_12 : f32 to vector<2x8xf32>
    %30 = arith.divf %28, %29 : vector<2x8xf32>
    %31 = arith.mulf %27, %27 : vector<2x8xf32>
    %32 = arith.subf %30, %31 : vector<2x8xf32>
    %cst_13 = arith.constant 0.000000e+00 : f32
    %33 = vector.broadcast %cst_13 : f32 to vector<2x8xf32>
    %34 = arith.maximumf %32, %33 : vector<2x8xf32>
    %cst_14 = arith.constant 9.99999974E-6 : f32
    %35 = vector.broadcast %cst_14 : f32 to vector<2x8xf32>
    %36 = arith.addf %34, %35 : vector<2x8xf32>
    %37 = math.rsqrt %36 : vector<2x8xf32>
    %38 = tpu.concatenate %27, %37 in 1 : vector<2x8xf32>, vector<2x8xf32> -> vector<2x16xf32>
    %c0_15 = arith.constant 0 : index
    %c0_16 = arith.constant 0 : index
    %39 = vector.load %arg8[%c0_15, %c0_16] : memref<16x128xf32, #tpu.memory_space<vmem>>, vector<16x128xf32>
    %cst_17 = arith.constant dense<0.000000e+00> : vector<2x128xf32>
    %40 = tpu.matmul %38, %39, %cst_17 {dimension_numbers = #tpu.dot_dimension_numbers<[1], [0], [0], [1], [0, 0, 1, 1], [], []>} : vector<2x16xf32>, vector<16x128xf32>, vector<2x128xf32> -> vector<2x128xf32>
    %41 = vector.extract_strided_slice %40 {offsets = [0, 0], sizes = [2, 64], strides = [1, 1]} : vector<2x128xf32> to vector<2x64xf32>
    %42 = vector.shape_cast %41 : vector<2x64xf32> to vector<2x1x64xf32>
    %43 = vector.extract_strided_slice %40 {offsets = [0, 64], sizes = [2, 64], strides = [1, 1]} : vector<2x128xf32> to vector<2x64xf32>
    %44 = vector.shape_cast %43 : vector<2x64xf32> to vector<2x1x64xf32>
    %45 = vector.broadcast %42 : vector<2x1x64xf32> to vector<2x24x64xf32>
    %46 = arith.subf %16, %45 : vector<2x24x64xf32>
    %47 = vector.broadcast %44 : vector<2x1x64xf32> to vector<2x24x64xf32>
    %48 = arith.mulf %46, %47 : vector<2x24x64xf32>
    %49 = vector.shape_cast %2 : vector<1x64xf32> to vector<1x1x64xf32>
    %50 = vector.broadcast %49 : vector<1x1x64xf32> to vector<2x24x64xf32>
    %51 = arith.mulf %48, %50 : vector<2x24x64xf32>
    %52 = vector.shape_cast %4 : vector<1x64xf32> to vector<1x1x64xf32>
    %53 = vector.broadcast %52 : vector<1x1x64xf32> to vector<2x24x64xf32>
    %54 = arith.addf %51, %53 : vector<2x24x64xf32>
    %cst_18 = arith.constant 2.000000e+01 : f32
    %55 = vector.broadcast %cst_18 : f32 to vector<2x24x64xf32>
    %56 = arith.minimumf %54, %55 : vector<2x24x64xf32>
    %57 = math.exp %56 : vector<2x24x64xf32>
    %cst_19 = arith.constant 2.000000e+00 : f32
    %58 = vector.broadcast %cst_19 : f32 to vector<2x24x64xf32>
    %59 = arith.addf %57, %58 : vector<2x24x64xf32>
    %60 = arith.mulf %57, %59 : vector<2x24x64xf32>
    %61 = arith.mulf %54, %60 : vector<2x24x64xf32>
    %cst_20 = arith.constant 2.000000e+00 : f32
    %62 = vector.broadcast %cst_20 : f32 to vector<2x24x64xf32>
    %63 = arith.addf %60, %62 : vector<2x24x64xf32>
    %64 = tpu.reciprocal %63 {approx = true} : vector<2x24x64xf32> -> vector<2x24x64xf32>
    %65 = arith.mulf %61, %64 : vector<2x24x64xf32>
    %c0_21 = arith.constant 0 : index
    %c0_22 = arith.constant 0 : index
    %66 = vector.load %arg2[%c0_21, %c0_22] : memref<2x4xf32, #tpu.memory_space<vmem>>, vector<2x4xf32>
    %cst_23 = arith.constant 2.000000e+01 : f32
    %67 = vector.broadcast %cst_23 : f32 to vector<2x4xf32>
    %68 = arith.minimumf %66, %67 : vector<2x4xf32>
    %69 = math.exp %68 : vector<2x4xf32>
    %cst_24 = arith.constant 2.000000e+00 : f32
    %70 = vector.broadcast %cst_24 : f32 to vector<2x4xf32>
    %71 = arith.addf %69, %70 : vector<2x4xf32>
    %72 = arith.mulf %69, %71 : vector<2x4xf32>
    %73 = arith.mulf %66, %72 : vector<2x4xf32>
    %cst_25 = arith.constant 2.000000e+00 : f32
    %74 = vector.broadcast %cst_25 : f32 to vector<2x4xf32>
    %75 = arith.addf %72, %74 : vector<2x4xf32>
    %76 = tpu.reciprocal %75 {approx = true} : vector<2x4xf32> -> vector<2x4xf32>
    %77 = arith.mulf %73, %76 : vector<2x4xf32>
    %c0_26 = arith.constant 0 : index
    %c0_27 = arith.constant 0 : index
    %78 = vector.load %arg4[%c0_26, %c0_27] : memref<4x64xf32, #tpu.memory_space<vmem>>, vector<4x64xf32>
    %cst_28 = arith.constant dense<0.000000e+00> : vector<2x64xf32>
    %79 = tpu.matmul %77, %78, %cst_28 {dimension_numbers = #tpu.dot_dimension_numbers<[1], [0], [0], [1], [0, 0, 1, 1], [], []>} : vector<2x4xf32>, vector<4x64xf32>, vector<2x64xf32> -> vector<2x64xf32>
    %80 = vector.broadcast %6 : vector<1x64xf32> to vector<2x64xf32>
    %81 = arith.addf %79, %80 : vector<2x64xf32>
    %82 = vector.shape_cast %81 : vector<2x64xf32> to vector<2x1x64xf32>
    %83 = vector.broadcast %82 : vector<2x1x64xf32> to vector<2x24x64xf32>
    %84 = arith.addf %65, %83 : vector<2x24x64xf32>
    %85 = tpu.iota {dimensions = array<i32: 0>} : vector<24x64xi32>
    %c2_i32 = arith.constant 2 : i32
    %86 = tpu.dynamic_rotate %84 by %c2_i32 dim 1 : vector<2x24x64xf32>, i32 -> vector<2x24x64xf32>
    %c2_i32_29 = arith.constant 2 : i32
    %87 = vector.broadcast %c2_i32_29 : i32 to vector<24x64xi32>
    %88 = arith.cmpi sge, %85, %87 : vector<24x64xi32>
    %c24_i32 = arith.constant 24 : i32
    %89 = vector.broadcast %c24_i32 : i32 to vector<24x64xi32>
    %90 = arith.cmpi slt, %85, %89 : vector<24x64xi32>
    %91 = arith.andi %88, %90 : vector<24x64xi1>
    %cst_30 = arith.constant 0.000000e+00 : f32
    %92 = vector.shape_cast %91 : vector<24x64xi1> to vector<1x24x64xi1>
    %93 = vector.broadcast %92 : vector<1x24x64xi1> to vector<2x24x64xi1>
    %94 = vector.broadcast %cst_30 : f32 to vector<2x24x64xf32>
    %95 = arith.select %93, %86, %94 : vector<2x24x64xi1>, vector<2x24x64xf32>
    %c1_i32 = arith.constant 1 : i32
    %96 = tpu.dynamic_rotate %84 by %c1_i32 dim 1 : vector<2x24x64xf32>, i32 -> vector<2x24x64xf32>
    %c1_i32_31 = arith.constant 1 : i32
    %97 = vector.broadcast %c1_i32_31 : i32 to vector<24x64xi32>
    %98 = arith.cmpi sge, %85, %97 : vector<24x64xi32>
    %c24_i32_32 = arith.constant 24 : i32
    %99 = vector.broadcast %c24_i32_32 : i32 to vector<24x64xi32>
    %100 = arith.cmpi slt, %85, %99 : vector<24x64xi32>
    %101 = arith.andi %98, %100 : vector<24x64xi1>
    %cst_33 = arith.constant 0.000000e+00 : f32
    %102 = vector.shape_cast %101 : vector<24x64xi1> to vector<1x24x64xi1>
    %103 = vector.broadcast %102 : vector<1x24x64xi1> to vector<2x24x64xi1>
    %104 = vector.broadcast %cst_33 : f32 to vector<2x24x64xf32>
    %105 = arith.select %103, %96, %104 : vector<2x24x64xi1>, vector<2x24x64xf32>
    %c23_i32 = arith.constant 23 : i32
    %106 = tpu.dynamic_rotate %84 by %c23_i32 dim 1 : vector<2x24x64xf32>, i32 -> vector<2x24x64xf32>
    %c0_i32 = arith.constant 0 : i32
    %107 = vector.broadcast %c0_i32 : i32 to vector<24x64xi32>
    %108 = arith.cmpi sge, %85, %107 : vector<24x64xi32>
    %c23_i32_34 = arith.constant 23 : i32
    %109 = vector.broadcast %c23_i32_34 : i32 to vector<24x64xi32>
    %110 = arith.cmpi slt, %85, %109 : vector<24x64xi32>
    %111 = arith.andi %108, %110 : vector<24x64xi1>
    %cst_35 = arith.constant 0.000000e+00 : f32
    %112 = vector.shape_cast %111 : vector<24x64xi1> to vector<1x24x64xi1>
    %113 = vector.broadcast %112 : vector<1x24x64xi1> to vector<2x24x64xi1>
    %114 = vector.broadcast %cst_35 : f32 to vector<2x24x64xf32>
    %115 = arith.select %113, %106, %114 : vector<2x24x64xi1>, vector<2x24x64xf32>
    %c22_i32 = arith.constant 22 : i32
    %116 = tpu.dynamic_rotate %84 by %c22_i32 dim 1 : vector<2x24x64xf32>, i32 -> vector<2x24x64xf32>
    %c0_i32_36 = arith.constant 0 : i32
    %117 = vector.broadcast %c0_i32_36 : i32 to vector<24x64xi32>
    %118 = arith.cmpi sge, %85, %117 : vector<24x64xi32>
    %c22_i32_37 = arith.constant 22 : i32
    %119 = vector.broadcast %c22_i32_37 : i32 to vector<24x64xi32>
    %120 = arith.cmpi slt, %85, %119 : vector<24x64xi32>
    %121 = arith.andi %118, %120 : vector<24x64xi1>
    %cst_38 = arith.constant 0.000000e+00 : f32
    %122 = vector.shape_cast %121 : vector<24x64xi1> to vector<1x24x64xi1>
    %123 = vector.broadcast %122 : vector<1x24x64xi1> to vector<2x24x64xi1>
    %124 = vector.broadcast %cst_38 : f32 to vector<2x24x64xf32>
    %125 = arith.select %123, %116, %124 : vector<2x24x64xi1>, vector<2x24x64xf32>
    %126 = tpu.concatenate %95, %105, %84, %115, %125 in 2 : vector<2x24x64xf32>, vector<2x24x64xf32>, vector<2x24x64xf32>, vector<2x24x64xf32>, vector<2x24x64xf32> -> vector<2x24x320xf32>
    %127 = vector.shape_cast %126 : vector<2x24x320xf32> to vector<48x320xf32>
    %128 = arith.truncf %127 : vector<48x320xf32> to vector<48x320xbf16>
    %c0_39 = arith.constant 0 : index
    %c0_40 = arith.constant 0 : index
    %129 = vector.load %arg5[%c0_39, %c0_40] : memref<320x64xbf16, #tpu.memory_space<vmem>>, vector<320x64xbf16>
    %cst_41 = arith.constant dense<0.000000e+00> : vector<48x64xf32>
    %130 = tpu.matmul %128, %129, %cst_41 {dimension_numbers = #tpu.dot_dimension_numbers<[1], [0], [0], [1], [0, 0, 1, 1], [], []>} : vector<48x320xbf16>, vector<320x64xbf16>, vector<48x64xf32> -> vector<48x64xf32>
    %131 = vector.broadcast %7 : vector<1x64xf32> to vector<48x64xf32>
    %132 = arith.addf %130, %131 : vector<48x64xf32>
    %133 = vector.shape_cast %132 : vector<48x64xf32> to vector<2x24x64xf32>
    %cst_42 = arith.constant dense<0.000000e+00> : vector<2x64xf32>
    %134 = vector.multi_reduction <add>, %133, %cst_42 [1] : vector<2x24x64xf32> to vector<2x64xf32>
    %135 = arith.mulf %133, %133 : vector<2x24x64xf32>
    %cst_43 = arith.constant dense<0.000000e+00> : vector<2x64xf32>
    %136 = vector.multi_reduction <add>, %135, %cst_43 [1] : vector<2x24x64xf32> to vector<2x64xf32>
    %137 = tpu.concatenate %134, %136 in 1 : vector<2x64xf32>, vector<2x64xf32> -> vector<2x128xf32>
    %c0_44 = arith.constant 0 : index
    %c0_45 = arith.constant 0 : index
    %138 = vector.load %arg7[%c0_44, %c0_45] : memref<128x16xf32, #tpu.memory_space<vmem>>, vector<128x16xf32>
    %cst_46 = arith.constant dense<0.000000e+00> : vector<2x16xf32>
    %139 = tpu.matmul %137, %138, %cst_46 {dimension_numbers = #tpu.dot_dimension_numbers<[1], [0], [0], [1], [0, 0, 1, 1], [], []>} : vector<2x128xf32>, vector<128x16xf32>, vector<2x16xf32> -> vector<2x16xf32>
    %140 = vector.extract_strided_slice %139 {offsets = [0, 0], sizes = [2, 8], strides = [1, 1]} : vector<2x16xf32> to vector<2x8xf32>
    %cst_47 = arith.constant 1.920000e+02 : f32
    %141 = vector.broadcast %cst_47 : f32 to vector<2x8xf32>
    %142 = arith.divf %140, %141 : vector<2x8xf32>
    %143 = vector.extract_strided_slice %139 {offsets = [0, 8], sizes = [2, 8], strides = [1, 1]} : vector<2x16xf32> to vector<2x8xf32>
    %cst_48 = arith.constant 1.920000e+02 : f32
    %144 = vector.broadcast %cst_48 : f32 to vector<2x8xf32>
    %145 = arith.divf %143, %144 : vector<2x8xf32>
    %146 = arith.mulf %142, %142 : vector<2x8xf32>
    %147 = arith.subf %145, %146 : vector<2x8xf32>
    %cst_49 = arith.constant 0.000000e+00 : f32
    %148 = vector.broadcast %cst_49 : f32 to vector<2x8xf32>
    %149 = arith.maximumf %147, %148 : vector<2x8xf32>
    %cst_50 = arith.constant 9.99999974E-6 : f32
    %150 = vector.broadcast %cst_50 : f32 to vector<2x8xf32>
    %151 = arith.addf %149, %150 : vector<2x8xf32>
    %152 = math.rsqrt %151 : vector<2x8xf32>
    %153 = tpu.concatenate %142, %152 in 1 : vector<2x8xf32>, vector<2x8xf32> -> vector<2x16xf32>
    %c0_51 = arith.constant 0 : index
    %c0_52 = arith.constant 0 : index
    %154 = vector.load %arg8[%c0_51, %c0_52] : memref<16x128xf32, #tpu.memory_space<vmem>>, vector<16x128xf32>
    %cst_53 = arith.constant dense<0.000000e+00> : vector<2x128xf32>
    %155 = tpu.matmul %153, %154, %cst_53 {dimension_numbers = #tpu.dot_dimension_numbers<[1], [0], [0], [1], [0, 0, 1, 1], [], []>} : vector<2x16xf32>, vector<16x128xf32>, vector<2x128xf32> -> vector<2x128xf32>
    %156 = vector.extract_strided_slice %155 {offsets = [0, 0], sizes = [2, 64], strides = [1, 1]} : vector<2x128xf32> to vector<2x64xf32>
    %157 = vector.shape_cast %156 : vector<2x64xf32> to vector<2x1x64xf32>
    %158 = vector.extract_strided_slice %155 {offsets = [0, 64], sizes = [2, 64], strides = [1, 1]} : vector<2x128xf32> to vector<2x64xf32>
    %159 = vector.shape_cast %158 : vector<2x64xf32> to vector<2x1x64xf32>
    %160 = vector.broadcast %157 : vector<2x1x64xf32> to vector<2x24x64xf32>
    %161 = arith.subf %133, %160 : vector<2x24x64xf32>
    %162 = vector.broadcast %159 : vector<2x1x64xf32> to vector<2x24x64xf32>
    %163 = arith.mulf %161, %162 : vector<2x24x64xf32>
    %164 = vector.shape_cast %3 : vector<1x64xf32> to vector<1x1x64xf32>
    %165 = vector.broadcast %164 : vector<1x1x64xf32> to vector<2x24x64xf32>
    %166 = arith.mulf %163, %165 : vector<2x24x64xf32>
    %167 = vector.shape_cast %5 : vector<1x64xf32> to vector<1x1x64xf32>
    %168 = vector.broadcast %167 : vector<1x1x64xf32> to vector<2x24x64xf32>
    %169 = arith.addf %166, %168 : vector<2x24x64xf32>
    %cst_54 = arith.constant 2.000000e+01 : f32
    %170 = vector.broadcast %cst_54 : f32 to vector<2x24x64xf32>
    %171 = arith.minimumf %169, %170 : vector<2x24x64xf32>
    %172 = math.exp %171 : vector<2x24x64xf32>
    %cst_55 = arith.constant 2.000000e+00 : f32
    %173 = vector.broadcast %cst_55 : f32 to vector<2x24x64xf32>
    %174 = arith.addf %172, %173 : vector<2x24x64xf32>
    %175 = arith.mulf %172, %174 : vector<2x24x64xf32>
    %176 = arith.mulf %169, %175 : vector<2x24x64xf32>
    %cst_56 = arith.constant 2.000000e+00 : f32
    %177 = vector.broadcast %cst_56 : f32 to vector<2x24x64xf32>
    %178 = arith.addf %175, %177 : vector<2x24x64xf32>
    %179 = tpu.reciprocal %178 {approx = true} : vector<2x24x64xf32> -> vector<2x24x64xf32>
    %180 = arith.mulf %176, %179 : vector<2x24x64xf32>
    %181 = arith.addf %180, %18 : vector<2x24x64xf32>
    %c0_57 = arith.constant 0 : index
    %c0_58 = arith.constant 0 : index
    %182 = vector.load %arg9[%c0_57, %c0_58] : memref<24x64xf32, #tpu.memory_space<vmem>>, vector<24x64xf32>
    %183 = vector.shape_cast %182 : vector<24x64xf32> to vector<1x24x64xf32>
    %184 = vector.broadcast %183 : vector<1x24x64xf32> to vector<2x24x64xf32>
    %185 = arith.mulf %181, %184 : vector<2x24x64xf32>
    %cst_59 = arith.constant dense<0.000000e+00> : vector<2x24xf32>
    %186 = vector.multi_reduction <add>, %185, %cst_59 [2] : vector<2x24x64xf32> to vector<2x24xf32>
    %cst_60 = arith.constant dense<0.000000e+00> : vector<2xf32>
    %187 = vector.multi_reduction <add>, %186, %cst_60 [1] : vector<2x24xf32> to vector<2xf32>
    %188 = vector.shape_cast %187 : vector<2xf32> to vector<2x1xf32>
    %189 = vector.broadcast %8 : vector<1x1xf32> to vector<2x1xf32>
    %190 = arith.addf %188, %189 : vector<2x1xf32>
    %191 = vector.shape_cast %190 : vector<2x1xf32> to vector<2x1xf32>
    %192 = vector.broadcast %191 : vector<2x1xf32> to vector<2x128xf32>
    %c0_61 = arith.constant 0 : index
    %c0_62 = arith.constant 0 : index
    %193 = vector.load %arg10[%c0_61, %c0_62] : memref<2x128xf32, #tpu.memory_space<vmem>>, vector<2x128xf32>
    tpu.vector_store %arg10[%c0_61, %c0_62], %192 {strides = array<i32>} : memref<2x128xf32, #tpu.memory_space<vmem>>, vector<2x128xf32>,
    return
  }
  func.func @transform_0(%arg0: i32) -> (i32, i32, i32) {
    %c0_i32 = arith.constant 0 : i32
    %c0_i32_0 = arith.constant 0 : i32
    %c0_i32_1 = arith.constant 0 : i32
    return %arg0, %c0_i32, %c0_i32_0 : i32, i32, i32
  }
  func.func @transform_1(%arg0: i32) -> (i32, i32) {
    %c0_i32 = arith.constant 0 : i32
    %c0_i32_0 = arith.constant 0 : i32
    return %arg0, %c0_i32 : i32, i32
  }
  func.func @transform_2(%arg0: i32) -> (i32, i32) {
    %c0_i32 = arith.constant 0 : i32
    %c0_i32_0 = arith.constant 0 : i32
    %c0_i32_1 = arith.constant 0 : i32
    return %c0_i32, %c0_i32_0 : i32, i32
  }
  func.func @transform_3(%arg0: i32) -> (i32, i32) {
    %c0_i32 = arith.constant 0 : i32
    %c0_i32_0 = arith.constant 0 : i32
    %c0_i32_1 = arith.constant 0 : i32
    return %c0_i32, %c0_i32_0 : i32, i32
  }
  func.func @transform_4(%arg0: i32) -> (i32, i32) {
    %c0_i32 = arith.constant 0 : i32
    %c0_i32_0 = arith.constant 0 : i32
    %c0_i32_1 = arith.constant 0 : i32
    return %c0_i32, %c0_i32_0 : i32, i32
  }
  func.func @transform_5(%arg0: i32) -> (i32, i32) {
    %c0_i32 = arith.constant 0 : i32
    %c0_i32_0 = arith.constant 0 : i32
    %c0_i32_1 = arith.constant 0 : i32
    return %c0_i32, %c0_i32_0 : i32, i32
  }
  func.func @transform_6(%arg0: i32) -> (i32, i32) {
    %c0_i32 = arith.constant 0 : i32
    %c0_i32_0 = arith.constant 0 : i32
    %c0_i32_1 = arith.constant 0 : i32
    return %c0_i32, %c0_i32_0 : i32, i32
  }
  func.func @transform_7(%arg0: i32) -> (i32, i32) {
    %c0_i32 = arith.constant 0 : i32
    %c0_i32_0 = arith.constant 0 : i32
    %c0_i32_1 = arith.constant 0 : i32
    return %c0_i32, %c0_i32_0 : i32, i32
  }
  func.func @transform_8(%arg0: i32) -> (i32, i32) {
    %c0_i32 = arith.constant 0 : i32
    %c0_i32_0 = arith.constant 0 : i32
    %c0_i32_1 = arith.constant 0 : i32
    return %c0_i32, %c0_i32_0 : i32, i32
  }
  func.func @transform_9(%arg0: i32) -> (i32, i32) {
    %c0_i32 = arith.constant 0 : i32
    %c0_i32_0 = arith.constant 0 : i32
    return %arg0, %c0_i32 : i32, i32
  }
}

</mosaic_0001>

<bundles_post_ra>
// kernel: discriminator_forward.1
= control target key start
LH: loop header
LB: loop body
LE: loop exit
PB: predicated region body
PF: predicated region fallthrough
CT: control target
= control target key end

     0   :  { %vm81_vm0 = vcmask 1041408   ;;  %v1955_v0 = vmov 0.0   ;;  %vm1956_vm1 = vmmov 0   ;;  %vm71_vm2 = vcmask 162816   ;;  %s1957_s28 = smov 64   ;;  %s1958_s11 = smov 8   ;;  %s2679_s2 = inlined_call_operand.vmem [shape: bf16[20,128], index: 2, kind: input, shape index: {}]   ;;  %s2680_s0 = inlined_call_operand.vmem [shape: bf16[2,24,20], index: 0, kind: input, shape index: {}]   ;;  %s2681_s6 = inlined_call_operand.vmem [shape: f32[128,16], index: 6, kind: input, shape index: {}]   ;;  %s2682_s5 = inlined_call_operand.vmem [shape: f32[8,128], index: 5, kind: input, shape index: {}]   ;;  %s2683_s7 = inlined_call_operand.vmem [shape: f32[16,128], index: 7, kind: input, shape index: {}]   ;;  %s2684_s1 = inlined_call_operand.vmem [shape: f32[2,4], index: 1, kind: input, shape index: {}]   ;;  %s2685_s3 = inlined_call_operand.vmem [shape: f32[4,64], index: 3, kind: input, shape index: {}]   ;;  %s2686_s4 = inlined_call_operand.vmem [shape: bf16[320,64], index: 4, kind: input, shape index: {}]   ;;  %s2687_s8 = inlined_call_operand.vmem [shape: f32[24,64], index: 8, kind: input, shape index: {}]   ;;  %s2688_s9 = inlined_call_operand.vmem [shape: f32[2,128], index: 9, kind: output, shape index: {}]  }
   0x1   :  { %1708 = vmatprep.subr.bf16.mxu0 %v1955_v0  ;;  %v1871_v1 = vld [vmem:[%s2679_s2 + $0x8] ss:$0 sps:$4 sm:$0x33]   ;;  %1712 = vmatprep.mubr.msk.bf16.mxu0 %vm1956_vm1, %v1955_v0  ;;  %v1872_v3 = vld [vmem:[%s2679_s2] sm:$0xff]   ;;  %v1875_v6 = vld [vmem:[%s2680_s0 + $0x10] sm:$0xff]   ;;  %v43_v22 = vlaneseq  ;;  %vm142_vm3 = vcmask 523264  }
   0x2   :  { %1724 = vmatprep.subr.mxu1 %v1955_v0  ;;  %1756 = vmatprep.mubr.msk.f32.mxu1 %vm1956_vm1, %v1955_v0  ;;  %v83_v2 = vsel %vm81_vm0, %v1871_v1, 0  ;;  %v1873_v4 = vld [vmem:[%s2680_s0] sm:$0xff]   ;;  %v1874_v5 = vld [vmem:[%s2680_s0 + $0x8] sm:$0xff]   ;;  %v2043_v7 = vld [vmem:[%s2681_s6 + $0x78] sm:$0xff]  ;;  %vm195_vm4 = vcmask 1041409   ;;  %vm302_vm5 = vcmask 64512  }
   0x3   :  { %1709 = vmatpush3.bf16.msra.mxu0 %v83_v2  ;;  %v2048_v8 = vld [vmem:[%s2681_s6 + $0x70] sm:$0xff]  ;;  %1725 = vmatpush3.msra.mxu1 %v2043_v7  ;;  %v2055_v9 = vld [vmem:[%s2681_s6 + $0x68] sm:$0xff]  ;;  %v2062_v10 = vld [vmem:[%s2681_s6 + $0x60] sm:$0xff]  ;;  %v2146_v23 = vshrl.u32 %v43_v22, 7  ;;  %vm306_vm6 = vcmask 130048   ;;  %vm524_vm7 = vcmask 1043456  }
   0x4   :  { %1710 = vmatprep.subr.bf16.mxu0 %v1955_v0  ;;  %1726 = vmatprep.subr.mxu1 %v1955_v0  ;;  %v2069_v11 = vld [vmem:[%s2681_s6 + $0x58] sm:$0xff]  ;;  %v2076_v12 = vld [vmem:[%s2681_s6 + $0x50] sm:$0xff]  ;;  %v2083_v13 = vld [vmem:[%s2681_s6 + $0x48] sm:$0xff]  ;;  %vm520_vm8 = vcmask 31744  }
   0x5   :  { %1727 = vmatpush3.msra.mxu1 %v2048_v8  ;;  %v2090_v14 = vld [vmem:[%s2681_s6 + $0x40] sm:$0xff]  ;;  %v2097_v15 = vld [vmem:[%s2681_s6 + $0x38] sm:$0xff]  ;;  %v2104_v16 = vld [vmem:[%s2681_s6 + $0x30] sm:$0xff]  ;;  %v2149_v24 = vsub.s32 0, %v2146_v23  ;;  %vm746_vm9 = vcmp.lt.s32.totalorder %v2146_v23, 6  ;;  %vm712_vm10 = vcmp.lt.s32.totalorder %v2146_v23, 7 }
   0x6   :  { %1728 = vmatprep.subr.mxu1 %v1955_v0  ;;  %v2111_v17 = vld [vmem:[%s2681_s6 + $0x28] sm:$0xff]  ;;  %v2118_v18 = vld [vmem:[%s2681_s6 + $0x20] sm:$0xff]  ;;  %v2125_v19 = vld [vmem:[%s2681_s6 + $0x18] sm:$0xff]  ;;  %vm681_vm11 = vcmp.lt.s32.totalorder %v2146_v23, 1  ;;  %vm688_vm12 = vcmp.ge.s32.totalorder %v2146_v23, 1  ;;  %vm647_vm15 = vcmp.lt.s32.totalorder %v2146_v23, 2 }
   0x7   :  { %1711 = vmatpush3.bf16.msra.mxu0 %v1872_v3  ;;  %1729 = vmatpush3.msra.mxu1 %v2055_v9  ;;  %v2132_v20 = vld [vmem:[%s2681_s6 + $0x10] sm:$0xff]  ;;  %v2139_v21 = vld [vmem:[%s2681_s6 + $0x8] sm:$0xff]  ;;  %v2154_v25 = vld [vmem:[%s2682_s5] sm:$0xff]  ;;  %vm654_vm0 = vcmp.ge.s32.totalorder %v2146_v23, 2 }
   0x8   :  { %1759 = vmatprep.subr.mxu0 %v1955_v0  ;;  %1730 = vmatprep.subr.mxu1 %v1955_v0  ;;  %v46_v26 = vrot.slane %v2154_v25, %v2149_v24  ;;  %v2191_v1 = vld [vmem:[%s2681_s6] sm:$0xff] }
   0x9   :  { %1731 = vmatpush3.msra.mxu1 %v2062_v10 }
   0xa   :  { %1713 = vmatmul.mubr.msk.bf16.vlgmr.msra.gmra.mxu0 %vm71_vm2, %v1873_v4  ;;  %1732 = vmatprep.subr.mxu1 %v1955_v0 }
   0xb   :  { %1716 = vmatprep.mubr.msk.bf16.mxu0 %vm1956_vm1, %v1955_v0  ;;  %1733 = vmatpush3.msra.mxu1 %v2069_v11 }
   0xc   :  { %1734 = vmatprep.subr.mxu1 %v1955_v0 }
   0xd   :  { %1735 = vmatpush3.msra.mxu1 %v2076_v12 }
   0xe   :  { %1736 = vmatprep.subr.mxu1 %v1955_v0 }
   0xf   :  { %1737 = vmatpush3.msra.mxu1 %v2083_v13 }
  0x10   :  { %1738 = vmatprep.subr.mxu1 %v1955_v0 }
  0x11   :  { %1739 = vmatpush3.msra.mxu1 %v2090_v14 }
  0x12   :  { %1717 = vmatmul.mubr.msk.bf16.gmra.mxu0 %vm71_vm2, %v1874_v5  ;;  %1740 = vmatprep.subr.mxu1 %v1955_v0 }
  0x13   :  { %1720 = vmatprep.mubr.msk.bf16.mxu0 %vm1956_vm1, %v1955_v0  ;;  %1741 = vmatpush3.msra.mxu1 %v2097_v15 }
  0x14   :  { %1742 = vmatprep.subr.mxu1 %v1955_v0 }
  0x15   :  { %1743 = vmatpush3.msra.mxu1 %v2104_v16 }
  0x16   :  { %1744 = vmatprep.subr.mxu1 %v1955_v0 }
  0x17   :  { %1745 = vmatpush3.msra.mxu1 %v2111_v17 }
  0x18   :  { %1746 = vmatprep.subr.mxu1 %v1955_v0 }
  0x19   :  { %1747 = vmatpush3.msra.mxu1 %v2118_v18 }
  0x1a   :  { %1721 = vmatmul.mubr.msk.bf16.gmra.mxu0 %vm71_vm2, %v1875_v6  ;;  %1748 = vmatprep.subr.mxu1 %v1955_v0  ;;  %vm1548_vm2 = vcmask 195712  }
  0x1b   :  { %1763 = vmatprep.mubr.msk.f32.mxu0 %vm1956_vm1, %v1955_v0  ;;  %1749 = vmatpush3.msra.mxu1 %v2125_v19 }
  0x1c   :  { %1750 = vmatprep.subr.mxu1 %v1955_v0 }
  0x1d   :  { %1751 = vmatpush3.msra.mxu1 %v2132_v20 }
  0x1e   :  { %1752 = vmatprep.subr.mxu1 %v1955_v0 }
  0x1f   :  { %1753 = vmatpush3.msra.mxu1 %v2139_v21 }
  0x20   :  { %1754 = vmatprep.subr.mxu1 %v1955_v0 }
  0x21   :  { %1755 = vmatpush3.msra.mxu1 %v2191_v1 }
  0xca   :  { %v119_v27 = vpop.f32.mrf.mxu0 }
  0xcb   :  { %v2158_v29 = vadd.f32 %v119_v27, %v46_v26 }
  0xcc   :  { %v1714_v28 = vpop.f32.mrf.mxu0 }
  0xcd   :  { %v165_v33 = vmul.f32 %v2158_v29, %v2158_v29 }
  0xce   :  { %v122_v30 = vpop.f32.mrf.mxu0 }
  0xcf   :  { %v2160_v31 = vadd.f32 %v122_v30, %v46_v26  ;;  %v171_v39 = vsel %vm142_vm3, %v165_v33, 0.0 }
  0xd0   :  { %v1715_v32 = vpop.f32.mrf.mxu0 }
  0xd1   :  { %v166_v34 = vmul.f32 %v2160_v31, %v2160_v31 }
  0xd2   :  { %v127_v35 = vpop.f32.mrf.mxu0 }
  0xd3   :  { %v172_v36 = vsel %vm142_vm3, %v166_v34, 0.0  ;;  %v2167_v37 = vadd.f32 %v127_v35, %v46_v26  ;;  %v144_v34 = vsel %vm142_vm3, %v2160_v31, 0.0 }
  0xd4   :  { %v1718_v38 = vpop.f32.mrf.mxu0  ;;  %v173_v41 = vadd.f32 %v172_v36, %v171_v39  ;;  %v143_v39 = vsel %vm142_vm3, %v2158_v29, 0.0 }
  0xd5   :  { %v167_v40 = vmul.f32 %v2167_v37, %v2167_v37 }
  0xd6   :  { %v130_v42 = vpop.f32.mrf.mxu0 }
  0xd7   :  { %v174_v43 = vsel %vm142_vm3, %v167_v40, 0.0  ;;  %v2173_v46 = vadd.f32 %v130_v42, %v46_v26  ;;  %v146_v40 = vsel %vm142_vm3, %v2167_v37, 0.0 }
  0xd8   :  { %v1719_v44 = vpop.f32.mrf.mxu0  ;;  %v175_v45 = vadd.f32 %v174_v43, %v173_v41  ;;  %v145_v41 = vadd.f32 %v144_v34, %v143_v39 }
  0xd9   :  { %v168_v51 = vmul.f32 %v2173_v46, %v2173_v46  ;;  %v154_v35 = vsel %vm142_vm3, %v2173_v46, 0.0 }
  0xda   :  { %v135_v47 = vpop.f32.mrf.mxu0  ;;  %v176_v50 = vrot.slane %v175_v45, 4  ;;  %v147_v43 = vadd.f32 %v146_v40, %v145_v41 }
  0xdb   :  { %v2175_v48 = vadd.f32 %v135_v47, %v46_v26  ;;  %v182_v58 = vsel %vm142_vm3, %v168_v51, 0.0 }
  0xdc   :  { %v1722_v49 = vpop.f32.mrf.mxu0  ;;  %v177_v57 = vadd.f32 %v176_v50, %v175_v45  ;;  %v148_v45 = vrot.slane %v147_v43, 4 }
  0xdd   :  { %v169_v52 = vmul.f32 %v2175_v48, %v2175_v48  ;;  %v155_v33 = vsel %vm142_vm3, %v2175_v48, 0.0 }
  0xde   :  { %v138_v53 = vpop.f32.mrf.mxu0  ;;  %v178_v62 = vrot.slane %v177_v57, 2  ;;  %v156_v38 = vadd.f32 %v155_v33, %v154_v35  ;;  %v149_v49 = vadd.f32 %v148_v45, %v147_v43  ;;  %v1959_v45 = vmov 1966171168  }
  0xdf   :  { %v183_v54 = vsel %vm142_vm3, %v169_v52, 0.0  ;;  %v2182_v55 = vadd.f32 %v138_v53, %v46_v26 }
  0xe0   :  { %v1723_v56 = vpop.f32.mrf.mxu0  ;;  %v184_v60 = vadd.f32 %v183_v54, %v182_v58  ;;  %v179_v3 = vadd.f32 %v178_v62, %v177_v57  ;;  %v150_v51 = vrot.slane %v149_v49, 2  ;;  %v305_v62 = vld [vmem:[%s2683_s7 + $0x8] sm:$0xff] }
  0xe1   :  { %v170_v59 = vmul.f32 %v2182_v55, %v2182_v55  ;;  %v157_v36 = vsel %vm142_vm3, %v2182_v55, 0.0  ;;  %1760 = vmatpush3.msra.mxu0 %v305_v62 }
  0xe2   :  { %v180_v6 = vrot.slane %v179_v3, 1  ;;  %v158_v42 = vadd.f32 %v157_v36, %v156_v38  ;;  %v151_v53 = vadd.f32 %v150_v51, %v149_v49  ;;  %1761 = vmatprep.subr.mxu0 %v1955_v0 }
  0xe3   :  { %v185_v61 = vsel %vm142_vm3, %v170_v59, 0.0 }
  0xe4   :  { %v186_v63 = vadd.f32 %v185_v61, %v184_v60  ;;  %v181_v28 = vadd.f32 %v180_v6, %v179_v3  ;;  %v159_v44 = vrot.slane %v158_v42, 4  ;;  %v152_v56 = vrot.slane %v151_v53, 1  ;;  %v505_v6 = vld [vmem:[%s2684_s1] sm:$0x3] }
  0xe6   :  { %v187_v2 = vrot.slane %v186_v63, 4  ;;  %v160_v47 = vadd.f32 %v159_v44, %v158_v42  ;;  %v153_v58 = vadd.f32 %v152_v56, %v151_v53  ;;  %v515_v42 = vld [vmem:[%s2685_s3] sm:$0xf] }
  0xe8   :  { %v188_v4 = vadd.f32 %v187_v2, %v186_v63  ;;  %v161_v50 = vrot.slane %v160_v47, 2  ;;  %v304_v63 = vld [vmem:[%s2683_s7] sm:$0xff] }
  0xe9   :  { %1762 = vmatpush3.msra.mxu0 %v304_v63  ;;  %v1877_v63 = vld [vmem:[%s2686_s4 + $0x90] sm:$0xff]  }
  0xea   :  { %v189_v5 = vrot.slane %v188_v4, 2  ;;  %v162_v52 = vadd.f32 %v161_v50, %v160_v47  ;;  %1766 = vmatprep.subr.mxu0 %v1955_v0  ;;  %v382_v47 = vunpack.c.l.s4 %v1959_v45 }
  0xec   :  { %v190_v26 = vadd.f32 %v189_v5, %v188_v4  ;;  %v163_v54 = vrot.slane %v162_v52, 1  ;;  %v383_v49 = vunpack.c.0.s8 %v382_v47 }
  0xee   :  { %v191_v27 = vrot.slane %v190_v26, 1  ;;  %v164_v57 = vadd.f32 %v163_v54, %v162_v52  ;;  %v2233_v50 = vsub.s32 %v383_v49, %v2146_v23 }
  0xf0   :  { %v192_v30 = vadd.f32 %v191_v27, %v190_v26  ;;  %v196_v60 = vsel %vm195_vm4, %v164_v57, %v153_v58  ;;  %v506_v26 = vmin.f32 %v505_v6, 20.0 }
  0xf2   :  { %v200_v32 = vsel %vm195_vm4, %v192_v30, %v181_v28  ;;  %v507_v27 = vmul.f32 1.442695, %v506_v26  ;;  %v1883_v26 = vld [vmem:[%s2686_s4 + $0x30] sm:$0xff]  }
  0xf3   :  { %201 = vrot.lane.b32.xlu0 %v200_v32, %s1957_s28 }
  0xf4   :  { %1896 = vpow2.f32 %v507_v27  ;;  %v1884_v27 = vld [vmem:[%s2686_s4 + $0x68] sm:$0xff]  }
 0x101   :  { %v1897_v28 = vpop.eup %1896 }
 0x102   :  { %v509_v30 = vadd.f32 2.0, %v1897_v28 }
 0x104   :  { %v510_v32 = vmul.f32 %v1897_v28, %v509_v30  ;;  %v1885_v28 = vld [vmem:[%s2686_s4 + $0x28] sm:$0xff]   ;;  %v1886_v30 = vld [vmem:[%s2686_s4 + $0x60] sm:$0xff]  }
 0x106   :  { %v512_v35 = vadd.f32 2.0, %v510_v32  ;;  %v511_v39 = vmul.f32 %v510_v32, %v505_v6  ;;  %v1882_v6 = vld [vmem:[%s2686_s4 + $0x70] sm:$0xff]   ;;  %v1887_v32 = vld [vmem:[%s2686_s4 + $0x20] sm:$0xff]  }
 0x108   :  { %1898 = vrcp.f32 %v512_v35  ;;  %v1890_v35 = vld [vmem:[%s2686_s4 + $0x50] sm:$0xff]  }
 0x115   :  { %v1899_v40 = vpop.eup %1898 }
 0x116   :  { %v514_v44 = vmul.f32 %v1899_v40, %v511_v39  ;;  %v1893_v39 = vld [vmem:[%s2686_s4 + $0x8] sm:$0xff]   ;;  %v433_v40 = vsub.s32 1, %v2146_v23 }
 0x165   :  { %v202_v59 = vpop.permute.xlu0 %201 }
 0x166   :  { %v204_v61 = vsel %vm142_vm3, %v196_v60, %v202_v59 }
 0x167   :  { %1757 = vmatmul.mubr.f32.vlgmr.msra.gmra.mxu1 %v204_v61  ;;  %v1876_v61 = vld [vmem:[%s2686_s4 + $0x98] sm:$0xff]  }
 0x227   :  { %v287_v2 = vpop.f32.mrf.mxu1 }
 0x228   :  { %v292_v3 = vmul.f32 0.0052083335, %v287_v2  ;;  %v1878_v2 = vld [vmem:[%s2686_s4 + $0x88] sm:$0xff]  }
 0x229   :  { %v1758_v4 = vpop.f32.mrf.mxu1 }
 0x22a   :  { %v293_v5 = vmul.f32 %v292_v3, %v292_v3  ;;  %v1880_v4 = vld [vmem:[%s2686_s4 + $0x78] sm:$0xff]  }
 0x22b   :  { %1647 = vmatprep.subr.bf16.mxu1 %v1880_v4 }
 0x22c   :  { %295 = vrot.lane.b32.xlu0 %v293_v5, %s1958_s11  ;;  %v1881_v5 = vld [vmem:[%s2686_s4 + $0x38] sm:$0xff]  }
 0x22d   :  { %1648 = vmatpush3.bf16.msra.mxu1 %v1881_v5 }
 0x22e   :  { %1649 = vmatprep.subr.bf16.mxu1 %v1882_v6 }
 0x231   :  { %1650 = vmatpush3.bf16.msra.mxu1 %v1883_v26 }
 0x232   :  { %1651 = vmatprep.subr.bf16.mxu1 %v1884_v27 }
 0x235   :  { %1652 = vmatpush3.bf16.msra.mxu1 %v1885_v28 }
 0x236   :  { %1653 = vmatprep.subr.bf16.mxu1 %v1886_v30 }
 0x239   :  { %1654 = vmatpush3.bf16.msra.mxu1 %v1887_v32 }
 0x29e   :  { %v296_v33 = vpop.permute.xlu0 %295 }
 0x29f   :  { %v298_v34 = vsub.f32 %v292_v3, %v296_v33  ;;  %v1888_v33 = vld [vmem:[%s2686_s4 + $0x58] sm:$0xff]  }
 0x2a0   :  { %1655 = vmatprep.subr.bf16.mxu1 %v1888_v33 }
 0x2a1   :  { %v299_v36 = vmax.f32 %v298_v34, 0.0  ;;  %v1889_v34 = vld [vmem:[%s2686_s4 + $0x18] sm:$0xff]  }
 0x2a2   :  { %1656 = vmatpush3.bf16.msra.mxu1 %v1889_v34 }
 0x2a3   :  { %v300_v38 = vadd.f32 1e-05, %v299_v36  ;;  %v1891_v36 = vld [vmem:[%s2686_s4 + $0x10] sm:$0xff]   ;;  %1657 = vmatprep.subr.bf16.mxu1 %v1890_v35 }
 0x2a5   :  { %1900 = vrsqrt.f32 %v300_v38  ;;  %v1892_v38 = vld [vmem:[%s2686_s4 + $0x48] sm:$0xff]  }
 0x2a6   :  { %1658 = vmatpush3.bf16.msra.mxu1 %v1891_v36 }
 0x2a7   :  { %1659 = vmatprep.subr.bf16.mxu1 %v1892_v38 }
 0x2aa   :  { %1660 = vmatpush3.bf16.msra.mxu1 %v1893_v39 }
 0x2b2   :  { %v1901_v41 = vpop.eup %1900 }
 0x2b3   :  { %v303_v43 = vsel %vm302_vm5, %v292_v3, %v1901_v41  ;;  %v1879_v3 = vld [vmem:[%s2686_s4 + $0x80] sm:$0xff]   ;;  %v443_v41 = vsub.s32 2, %v2146_v23 }
 0x2b4   :  { %1764 = vmatmul.mubr.msk.f32.vlgmr.msra.gmra.mxu0 %vm306_vm6, %v303_v43 }
 0x2b5   :  { %1767 = vmatpush3.msk.msra.mxu0 %vm524_vm7, %v515_v42  ;;  %1768 = vmatprep.mubr.msk.f32.mxu0 %vm1956_vm1, %v1955_v0  ;;  %v2308_v42 = vrot.slane %v2154_v25, %v433_v40  ;;  %v2314_v49 = vrot.slane %v2154_v25, %v443_v41 }
 0x2b6   :  { %1771 = vmatprep.subr.bf16.mxu0 %v1955_v0 }
 0x2b8   :  { %1769 = vmatmul.mubr.msk.f32.vlgmr.msra.gmra.mxu0 %vm520_vm8, %v514_v44 }
 0x2b9   :  { %1779 = vmatprep.mubr.msk.bf16.mxu0 %vm1956_vm1, %v1955_v0  ;;  %1772 = vmatpush3.bf16.msra.mxu0 %v1876_v61 }
 0x2ba   :  { %1773 = vmatprep.subr.bf16.mxu0 %v1955_v0 }
 0x2bd   :  { %1774 = vmatpush3.bf16.msra.mxu0 %v1877_v63 }
 0x2be   :  { %1775 = vmatprep.subr.bf16.mxu0 %v1955_v0 }
 0x2c1   :  { %1776 = vmatpush3.bf16.msra.mxu0 %v1878_v2 }
 0x2c2   :  { %1777 = vmatprep.subr.bf16.mxu0 %v1955_v0 }
 0x2c5   :  { %1778 = vmatpush3.bf16.msra.mxu0 %v1879_v3 }
 0x2c6   :  { %1791 = vmatprep.subr.mxu0 %v1955_v0 }
 0x374   :  { %v376_v51 = vpop.f32.mrf.mxu0 }
 0x375   :  { %v387_v52 = vrot.slane %v376_v51, %v2233_v50 }
 0x376   :  { %v1765_v53 = vpop.f32.mrf.mxu0 }
 0x377   :  { %v388_v54 = vcombine.high %v387_v52, %v387_v52  ;;  %v395_v56 = vrot.slane %v387_v52, %v2233_v50 }
 0x378   :  { %v2245_v60 = vpop.f32.mrf.mxu0 }
 0x379   :  { %v402_v57 = vrot.slane %v388_v54, %v2233_v50  ;;  %v406_v58 = vrot.slane %v395_v56, %v2149_v24 }
 0x37a   :  { %v1770_v62 = vpop.f32.mrf.mxu0 }
 0x37b   :  { %419 = vrot.lane.b32.xlu1 %v406_v58, %s1957_s28  ;;  %v2241_v59 = vrot.slane %v402_v57, %v2149_v24  ;;  %v413_v43 = vsub.f32 %v2158_v29, %v406_v58  ;;  %v414_v44 = vsub.f32 %v2160_v31, %v406_v58  ;;  %v415_v45 = vsub.f32 %v2167_v37, %v406_v58 }
 0x37d   :  { %v416_v61 = vsub.f32 %v2173_v46, %v2241_v59  ;;  %v417_v58 = vsub.f32 %v2175_v48, %v2241_v59  ;;  %v418_v63 = vsub.f32 %v2182_v55, %v2241_v59 }
 0x37f   :  { %421 = vrot.lane.b32.xlu1 %v2241_v59, %s1957_s28 }
 0x3ed   :  { %v420_v47 = vpop.permute.xlu1 %419 }
 0x3ee   :  { %v425_v51 = vmul.f32 %v420_v47, %v413_v43  ;;  %v426_v52 = vmul.f32 %v420_v47, %v414_v44  ;;  %v427_v53 = vmul.f32 %v420_v47, %v415_v45 }
 0x3f0   :  { %v435_v54 = vmul.f32 %v2308_v42, %v425_v51  ;;  %v436_v56 = vmul.f32 %v2308_v42, %v426_v52  ;;  %v437_v57 = vmul.f32 %v2308_v42, %v427_v53  ;;  %v518_v52 = vsub.s32 3, %v2146_v23 }
 0x3f1   :  { %v422_v62 = vpop.permute.xlu1 %421 }
 0x3f2   :  { %v2326_v2 = vadd.f32 %v2314_v49, %v435_v54  ;;  %v2329_v3 = vadd.f32 %v2314_v49, %v436_v56  ;;  %v2332_v4 = vadd.f32 %v2314_v49, %v437_v57  ;;  %v428_v5 = vmul.f32 %v422_v62, %v416_v61 }
 0x3f3   :  { %v429_v6 = vmul.f32 %v422_v62, %v417_v58  ;;  %v430_v26 = vmul.f32 %v422_v62, %v418_v63  ;;  %v2354_v57 = vrot.slane %v2154_v25, %v518_v52 }
 0x3f4   :  { %v451_v27 = vmin.f32 %v2326_v2, 20.0  ;;  %v452_v28 = vmin.f32 %v2329_v3, 20.0  ;;  %v453_v30 = vmin.f32 %v2332_v4, 20.0  ;;  %v438_v59 = vmul.f32 %v2308_v42, %v428_v5 }
 0x3f5   :  { %v439_v32 = vmul.f32 %v2308_v42, %v429_v6  ;;  %v440_v33 = vmul.f32 %v2308_v42, %v430_v26 }
 0x3f6   :  { %v457_v34 = vmul.f32 1.442695, %v451_v27  ;;  %v459_v35 = vmul.f32 1.442695, %v452_v28  ;;  %v461_v36 = vmul.f32 1.442695, %v453_v30  ;;  %v2341_v38 = vadd.f32 %v2314_v49, %v438_v59 }
 0x3f7   :  { %v2344_v39 = vadd.f32 %v2314_v49, %v439_v32  ;;  %v2347_v40 = vadd.f32 %v2314_v49, %v440_v33  ;;  %v595_v59 = vadd.f32 %v2245_v60, %v2354_v57 }
 0x3f8   :  { %1902 = vpow2.f32 %v457_v34  ;;  %v454_v41 = vmin.f32 %v2341_v38, 20.0 }
 0x3f9   :  { %1904 = vpow2.f32 %v459_v35  ;;  %v455_v43 = vmin.f32 %v2344_v39, 20.0  ;;  %v456_v44 = vmin.f32 %v2347_v40, 20.0 }
 0x3fa   :  { %1906 = vpow2.f32 %v461_v36  ;;  %v463_v45 = vmul.f32 1.442695, %v454_v41 }
 0x3fb   :  { %v465_v47 = vmul.f32 1.442695, %v455_v43  ;;  %v467_v51 = vmul.f32 1.442695, %v456_v44  ;;  %v605_v44 = vrot.slane %v595_v59, %v2233_v50 }
 0x3fc   :  { %1908 = vpow2.f32 %v463_v45 }
 0x3fd   :  { %1910 = vpow2.f32 %v465_v47  ;;  %v606_v52 = vcombine.high %v605_v44, %v605_v44  ;;  %v613_v60 = vrot.slane %v605_v44, %v2233_v50 }
 0x3fe   :  { %1912 = vpow2.f32 %v467_v51 }
 0x405   :  { %v1903_v53 = vpop.eup %1902 }
 0x406   :  { %v1905_v54 = vpop.eup %1904  ;;  %v469_v56 = vadd.f32 2.0, %v1903_v53 }
 0x407   :  { %v1907_v61 = vpop.eup %1906  ;;  %v470_v62 = vadd.f32 2.0, %v1905_v54 }
 0x408   :  { %v471_v58 = vadd.f32 2.0, %v1907_v61  ;;  %v475_v63 = vmul.f32 %v1903_v53, %v469_v56  ;;  %v620_v53 = vrot.slane %v606_v52, %v2233_v50  ;;  %v624_v56 = vrot.slane %v613_v60, %v2149_v24 }
 0x409   :  { %v1909_v5 = vpop.eup %1908  ;;  %v476_v6 = vmul.f32 %v1905_v54, %v470_v62 }
 0x40a   :  { %v1911_v26 = vpop.eup %1910  ;;  %v477_v27 = vmul.f32 %v1907_v61, %v471_v58  ;;  %v487_v28 = vadd.f32 2.0, %v475_v63  ;;  %v472_v30 = vadd.f32 2.0, %v1909_v5  ;;  %v481_v54 = vmul.f32 %v475_v63, %v2326_v2 }
 0x40b   :  { %v1913_v32 = vpop.eup %1912  ;;  %v488_v33 = vadd.f32 2.0, %v476_v6  ;;  %v473_v34 = vadd.f32 2.0, %v1911_v26  ;;  %v2364_v61 = vadd.s32 16, %v2146_v23  ;;  %v482_v58 = vmul.f32 %v476_v6, %v2329_v3 }
 0x40c   :  { %v489_v35 = vadd.f32 2.0, %v477_v27  ;;  %1914 = vrcp.f32 %v487_v28  ;;  %v474_v25 = vadd.f32 2.0, %v1913_v32  ;;  %v478_v36 = vmul.f32 %v1909_v5, %v472_v30 }
 0x40d   :  { %1916 = vrcp.f32 %v488_v33  ;;  %v479_v41 = vmul.f32 %v1911_v26, %v473_v34  ;;  %v483_v26 = vmul.f32 %v477_v27, %v2332_v4  ;;  %v628_v30 = vrot.slane %v620_v53, %v2149_v24  ;;  %v1894_v33 = vld [vmem:[%s2686_s4 + $0x40] sm:$0xff]  }
 0x40e   :  { %1918 = vrcp.f32 %v489_v35  ;;  %v480_v43 = vmul.f32 %v1913_v32, %v474_v25  ;;  %v490_v45 = vadd.f32 2.0, %v478_v36  ;;  %vm724_vm13 = vcmp.lt.s32.totalorder %v2364_v61, 23  ;;  %v1895_v34 = vld [vmem:[%s2686_s4] sm:$0xff]   ;;  %1661 = vmatprep.subr.bf16.mxu1 %v1894_v33 }
 0x40f   :  { %v491_v47 = vadd.f32 2.0, %v479_v41  ;;  %v484_v3 = vmul.f32 %v478_v36, %v2341_v38  ;;  %v485_v4 = vmul.f32 %v479_v41, %v2344_v39  ;;  %1662 = vmatpush3.bf16.msra.mxu1 %v1895_v34  ;;  %vm755_vm14 = vcmp.lt.s32.totalorder %v2364_v61, 22 }
 0x410   :  { %v492_v51 = vadd.f32 2.0, %v480_v43  ;;  %1920 = vrcp.f32 %v490_v45  ;;  %v486_v6 = vmul.f32 %v480_v43, %v2347_v40 }
 0x411   :  { %1922 = vrcp.f32 %v491_v47 }
 0x412   :  { %1924 = vrcp.f32 %v492_v51 }
 0x419   :  { %v1915_v62 = vpop.eup %1914 }
 0x41a   :  { %v1917_v5 = vpop.eup %1916  ;;  %v499_v28 = vmul.f32 %v1915_v62, %v481_v54 }
 0x41b   :  { %v1919_v59 = vpop.eup %1918  ;;  %v500_v32 = vmul.f32 %v1917_v5, %v482_v58 }
 0x41c   :  { %v501_v2 = vmul.f32 %v1919_v59, %v483_v26  ;;  %v2372_v63 = vadd.f32 %v624_v56, %v499_v28 }
 0x41d   :  { %v2379_v27 = vadd.f32 %v624_v56, %v500_v32  ;;  %v1921_v35 = vpop.eup %1920 }
 0x41e   :  { %v2387_v25 = vadd.f32 %v624_v56, %v501_v2  ;;  %v740_v44 = vrot.slane %v2372_v63, 2  ;;  %v706_v38 = vrot.slane %v2372_v63, 1  ;;  %v675_v39 = vrot.slane %v2372_v63, 7  ;;  %v1923_v40 = vpop.eup %1922 }
 0x41f   :  { %v502_v36 = vmul.f32 %v1921_v35, %v484_v3  ;;  %v742_v41 = vrot.slane %v2379_v27, 2  ;;  %v708_v43 = vrot.slane %v2379_v27, 1  ;;  %v677_v45 = vrot.slane %v2379_v27, 7  ;;  %v1925_v47 = vpop.eup %1924 }
 0x420   :  { %v503_v51 = vmul.f32 %v1923_v40, %v485_v4  ;;  %v744_v52 = vrot.slane %v2387_v25, 2  ;;  %v710_v60 = vrot.slane %v2387_v25, 1  ;;  %v679_v53 = vrot.slane %v2387_v25, 7 }
 0x421   :  { %v504_v54 = vmul.f32 %v1925_v47, %v486_v6  ;;  %v2398_v56 = vadd.f32 %v628_v30, %v502_v36  ;;  %v749_v62 = vsel %vm746_vm9, %v740_v44, %v742_v41  ;;  %v715_v58 = vsel %vm712_vm10, %v706_v38, %v708_v43 }
 0x422   :  { %v2404_v5 = vadd.f32 %v628_v30, %v503_v51  ;;  %v747_v26 = vsel %vm746_vm9, %v742_v41, %v744_v52  ;;  %v713_v28 = vsel %vm712_vm10, %v708_v43, %v710_v60  ;;  %v684_v59 = vsel %vm681_vm11, %v675_v39, %v677_v45 }
 0x423   :  { %v2412_v32 = vadd.f32 %v628_v30, %v504_v54  ;;  %v833_v2 = vpack.c.bf16 %v747_v26, %v749_v62  ;;  %v1839_v3 = vpack.i.bf16 %v713_v28, %v715_v58  ;;  %v686_v4 = vsel %vm681_vm11, %v679_v53, %v675_v39 }
 0x424   :  { %v700_v6 = vsel %vm688_vm12, %v686_v4, 0.0  ;;  %v707_v33 = vrot.slane %v2398_v56, 1  ;;  %v709_v34 = vrot.slane %v2404_v5, 1  ;;  %v717_v35 = vsel %vm712_vm10, %v710_v60, %v706_v38 }
 0x425   :  { %1780 = vmatmul.mubr.msk.bf16.vlgmr.msra.gmra.mxu0 %vm142_vm3, %v833_v2  ;;  %1840 = vrot.lane.b32.xlu0 %v1839_v3, %s1957_s28  ;;  %v1844_v30 = vpack.i.bf16 %v684_v59, %v700_v6  ;;  %v676_v40 = vrot.slane %v2398_v56, 7  ;;  %v680_v36 = vrot.slane %v2412_v32, 7  ;;  %v736_v41 = vsel %vm724_vm13, %v717_v35, 0.0 }
 0x426   :  { %v716_v39 = vsel %vm712_vm10, %v707_v33, %v709_v34  ;;  %1783 = vmatprep.mubr.msk.bf16.mxu0 %vm1956_vm1, %v1955_v0  ;;  %v741_v38 = vrot.slane %v2398_v56, 2  ;;  %v743_v43 = vrot.slane %v2404_v5, 2  ;;  %1792 = vmatpush3.msra.mxu0 %v2043_v7  ;;  %v751_v60 = vsel %vm746_vm9, %v744_v52, %v740_v44 }
 0x427   :  { %1845 = vrot.lane.b32.xlu1 %v1844_v30, %s1957_s28  ;;  %v1849_v47 = vpack.i.bf16 %v716_v39, %v736_v41  ;;  %v687_v51 = vsel %vm681_vm11, %v680_v36, %v676_v40  ;;  %v711_v54 = vrot.slane %v2412_v32, 1  ;;  %1793 = vmatprep.subr.mxu0 %v1955_v0  ;;  %v682_v62 = vsel %vm681_vm11, %v677_v45, %v679_v53 }
 0x428   :  { %v703_v58 = vsel %vm688_vm12, %v687_v51, 0.0  ;;  %v750_v7 = vsel %vm746_vm9, %v741_v38, %v743_v43  ;;  %v678_v26 = vrot.slane %v2404_v5, 7  ;;  %1794 = vmatpush3.msra.mxu0 %v2048_v8  ;;  %v767_v52 = vsel %vm755_vm14, %v751_v60, 0.0 }
 0x429   :  { %1850 = vrot.lane.b32.xlu0 %v1849_v47, %s1957_s28  ;;  %v1854_v44 = vpack.i.bf16 %v703_v58, %v682_v62  ;;  %v714_v28 = vsel %vm712_vm10, %v709_v34, %v711_v54  ;;  %v718_v45 = vsel %vm712_vm10, %v711_v54, %v707_v33  ;;  %v745_v2 = vrot.slane %v2412_v32, 2  ;;  %1795 = vmatprep.subr.mxu0 %v1955_v0 }
 0x42a   :  { %v739_v53 = vsel %vm724_vm13, %v718_v45, 0.0  ;;  %v683_v59 = vsel %vm681_vm11, %v678_v26, %v680_v36  ;;  %v685_v8 = vsel %vm681_vm11, %v676_v40, %v678_v26  ;;  %v836_v3 = vpack.c.bf16 %v750_v7, %v767_v52  ;;  %1796 = vmatpush3.msra.mxu0 %v2055_v9 }
 0x42b   :  { %1855 = vrot.lane.b32.xlu1 %v1854_v44, %s1957_s28  ;;  %v1859_v4 = vpack.i.bf16 %v739_v53, %v714_v28  ;;  %1797 = vmatprep.subr.mxu0 %v1955_v0  ;;  %v1864_v6 = vpack.i.bf16 %v683_v59, %v685_v8  ;;  %v752_v33 = vsel %vm746_vm9, %v745_v2, %v741_v38 }
 0x42c   :  { %1798 = vmatpush3.msra.mxu0 %v2062_v10  ;;  %v748_v9 = vsel %vm746_vm9, %v743_v43, %v745_v2  ;;  %v770_v34 = vsel %vm755_vm14, %v752_v33, 0.0  ;;  %v644_v2 = vrot.slane %v2404_v5, 6 }
 0x42d   :  { %1784 = vmatmul.mubr.msk.bf16.gmra.mxu0 %vm142_vm3, %v836_v3  ;;  %1860 = vrot.lane.b32.xlu0 %v1859_v4, %s1957_s28  ;;  %v839_v10 = vpack.c.bf16 %v770_v34, %v748_v9 }
 0x42e   :  { %1787 = vmatprep.mubr.msk.bf16.mxu0 %vm1956_vm1, %v1955_v0  ;;  %1799 = vmatprep.subr.mxu0 %v1955_v0 }
 0x42f   :  { %1865 = vrot.lane.b32.xlu1 %v1864_v6, %s1957_s28  ;;  %1800 = vmatpush3.msra.mxu0 %v2069_v11  ;;  %v645_v11 = vrot.slane %v2387_v25, 6 }
 0x430   :  { %1801 = vmatprep.subr.mxu0 %v1955_v0 }
 0x431   :  { %1001 = vrot.lane.b32.xlu0 %v2354_v57, %s1957_s28  ;;  %1802 = vmatpush3.msra.mxu0 %v2076_v12  ;;  %v641_v12 = vrot.slane %v2372_v63, 6 }
 0x432   :  { %1803 = vmatprep.subr.mxu0 %v1955_v0 }
 0x433   :  { %1804 = vmatpush3.msra.mxu0 %v2083_v13 }
 0x434   :  { %1805 = vmatprep.subr.mxu0 %v1955_v0 }
 0x435   :  { %1788 = vmatmul.mubr.msk.bf16.gmra.mxu0 %vm142_vm3, %v839_v10 }
 0x436   :  { %1806 = vmatpush3.msra.mxu0 %v2090_v14  ;;  %1823 = vmatprep.mubr.msk.f32.mxu0 %vm1956_vm1, %v1955_v0  ;;  %v643_v14 = vrot.slane %v2379_v27, 6 }
 0x437   :  { %1807 = vmatprep.subr.mxu0 %v1955_v0 }
 0x438   :  { %1808 = vmatpush3.msra.mxu0 %v2097_v15  ;;  %v650_v35 = vsel %vm647_vm15, %v641_v12, %v643_v14  ;;  %v648_v52 = vsel %vm647_vm15, %v643_v14, %v645_v11 }
 0x439   :  { %1809 = vmatprep.subr.mxu0 %v1955_v0 }
 0x43a   :  { %1810 = vmatpush3.msra.mxu0 %v2104_v16 }
 0x43b   :  { %1811 = vmatprep.subr.mxu0 %v1955_v0 }
 0x43c   :  { %1812 = vmatpush3.msra.mxu0 %v2111_v17  ;;  %v652_v17 = vsel %vm647_vm15, %v645_v11, %v641_v12 }
 0x43d   :  { %1813 = vmatprep.subr.mxu0 %v1955_v0  ;;  %v669_v30 = vsel %vm654_vm0, %v652_v17, 0.0 }
 0x43e   :  { %1814 = vmatpush3.msra.mxu0 %v2118_v18 }
 0x43f   :  { %1815 = vmatprep.subr.mxu0 %v1955_v0 }
 0x440   :  { %1816 = vmatpush3.msra.mxu0 %v2125_v19  ;;  %v642_v19 = vrot.slane %v2398_v56, 6 }
 0x441   :  { %1817 = vmatprep.subr.mxu0 %v1955_v0 }
 0x442   :  { %1818 = vmatpush3.msra.mxu0 %v2132_v20  ;;  %v646_v20 = vrot.slane %v2412_v32, 6  ;;  %v651_v9 = vsel %vm647_vm15, %v642_v19, %v644_v2 }
 0x443   :  { %1819 = vmatprep.subr.mxu0 %v1955_v0 }
 0x444   :  { %1820 = vmatpush3.msra.mxu0 %v2139_v21  ;;  %v649_v33 = vsel %vm647_vm15, %v644_v2, %v646_v20 }
 0x445   :  { %1821 = vmatprep.subr.mxu0 %v1955_v0 }
 0x446   :  { %1822 = vmatpush3.msra.mxu0 %v2191_v1 }
 0x447   :  { %1826 = vmatprep.subr.mxu0 %v1955_v0 }
 0x497   :  { %v1841_v13 = vpop.permute.xlu0 %1840 }
 0x498   :  { %v1843_v15 = vunpack.i.h.bf16 %v1841_v13  ;;  %v1842_v16 = vunpack.i.l.bf16 %v1841_v13 }
 0x499   :  { %v1846_v18 = vpop.permute.xlu1 %1845 }
 0x49a   :  { %v1848_v21 = vunpack.i.h.bf16 %v1846_v18  ;;  %v1847_v1 = vunpack.i.l.bf16 %v1846_v18  ;;  %v825_v57 = vsel %vm142_vm3, %v2372_v63, %v1842_v16  ;;  %v826_v61 = vsel %vm142_vm3, %v2379_v27, %v1843_v15 }
 0x49b   :  { %v1851_v40 = vpop.permute.xlu0 %1850  ;;  %v832_v36 = vpack.c.bf16 %v826_v61, %v825_v57  ;;  %v653_v63 = vsel %vm647_vm15, %v646_v20, %v642_v19 }
 0x49c   :  { %v819_v39 = vsel %vm142_vm3, %v669_v30, %v1847_v1  ;;  %v820_v41 = vsel %vm142_vm3, %v650_v35, %v1848_v21  ;;  %v1853_v38 = vunpack.i.h.bf16 %v1851_v40  ;;  %v1852_v43 = vunpack.i.l.bf16 %v1851_v40 }
 0x49d   :  { %v831_v47 = vpack.c.bf16 %v820_v41, %v819_v39  ;;  %v1856_v51 = vpop.permute.xlu1 %1855  ;;  %1045 = vmatprep.mubr.bf16.mxu1 %v832_v36  ;;  %v672_v28 = vsel %vm654_vm0, %v653_v63, 0.0 }
 0x49e   :  { %v1858_v27 = vunpack.i.h.bf16 %v1856_v51  ;;  %v1857_v60 = vunpack.i.l.bf16 %v1856_v51  ;;  %v827_v54 = vsel %vm142_vm3, %v2387_v25, %v1852_v43  ;;  %v828_v62 = vsel %vm142_vm3, %v2398_v56, %v1853_v38 }
 0x49f   :  { %1046 = vmatmul.mubr.bf16.vlgmr.msra.gmra.mxu1 %v831_v47  ;;  %v1861_v58 = vpop.permute.xlu0 %1860  ;;  %v835_v7 = vpack.c.bf16 %v828_v62, %v827_v54 }
 0x4a0   :  { %v1863_v26 = vunpack.i.h.bf16 %v1861_v58  ;;  %v1862_v44 = vunpack.i.l.bf16 %v1861_v58  ;;  %v821_v45 = vsel %vm142_vm3, %v648_v52, %v1857_v60  ;;  %v822_v53 = vsel %vm142_vm3, %v672_v28, %v1858_v27 }
 0x4a1   :  { %1053 = vmatprep.mubr.bf16.mxu1 %v835_v7  ;;  %v1866_v25 = vpop.permute.xlu1 %1865  ;;  %v834_v8 = vpack.c.bf16 %v822_v53, %v821_v45 }
 0x4a2   :  { %v829_v56 = vsel %vm142_vm3, %v2404_v5, %v1862_v44  ;;  %v830_v59 = vsel %vm142_vm3, %v2412_v32, %v1863_v26  ;;  %v1868_v3 = vunpack.i.h.bf16 %v1866_v25  ;;  %v1867_v4 = vunpack.i.l.bf16 %v1866_v25 }
 0x4a3   :  { %v838_v6 = vpack.c.bf16 %v830_v59, %v829_v56  ;;  %v1002_v61 = vpop.permute.xlu0 %1001 }
 0x4a4   :  { %v823_v34 = vsel %vm142_vm3, %v651_v9, %v1867_v4  ;;  %v824_v10 = vsel %vm142_vm3, %v649_v33, %v1868_v3 }
 0x4a5   :  { %v837_v11 = vpack.c.bf16 %v824_v10, %v823_v34 }
 0x4a7   :  { %1054 = vmatmul.mubr.bf16.gmra.mxu1 %v834_v8 }
 0x4a8   :  { %1061 = vmatprep.mubr.bf16.mxu1 %v838_v6 }
 0x4af   :  { %1062 = vmatmul.mubr.bf16.gmra.mxu1 %v837_v11 }
 0x4e5   :  { %v1104_v32 = vpop.f32.mrf.mxu0 }
 0x4e7   :  { %v1781_v12 = vpop.f32.mrf.mxu0 }
 0x4e9   :  { %v1107_v5 = vpop.f32.mrf.mxu0 }
 0x4eb   :  { %v1782_v13 = vpop.f32.mrf.mxu0 }
 0x4ed   :  { %v1112_v14 = vpop.f32.mrf.mxu0 }
 0x4ef   :  { %v1785_v15 = vpop.f32.mrf.mxu0 }
 0x4f1   :  { %v1115_v16 = vpop.f32.mrf.mxu0 }
 0x4f3   :  { %v1786_v17 = vpop.f32.mrf.mxu0 }
 0x4f5   :  { %v1120_v18 = vpop.f32.mrf.mxu0 }
 0x4f7   :  { %v1789_v21 = vpop.f32.mrf.mxu0 }
 0x4f9   :  { %v1123_v20 = vpop.f32.mrf.mxu0 }
 0x4fb   :  { %v1790_v1 = vpop.f32.mrf.mxu0 }
 0x55f   :  { %v1663_v57 = vpop.f32.mrf.mxu1 }
 0x561   :  { %v1664_v19 = vpop.f32.mrf.mxu1 }
 0x562   :  { %v1665_v35 = vadd.f32 %v1664_v19, %v1663_v57 }
 0x563   :  { %v1666_v30 = vpop.f32.mrf.mxu1 }
 0x564   :  { %v1048_v40 = vadd.f32 %v1665_v35, %v1002_v61 }
 0x565   :  { %v1667_v36 = vpop.f32.mrf.mxu1 }
 0x566   :  { %v1668_v39 = vadd.f32 %v1667_v36, %v1666_v30  ;;  %v2553_v38 = vadd.f32 %v1104_v32, %v1048_v40 }
 0x567   :  { %v1669_v41 = vpop.f32.mrf.mxu1 }
 0x568   :  { %v1051_v43 = vadd.f32 %v1668_v39, %v1002_v61  ;;  %v1149_v60 = vmul.f32 %v2553_v38, %v2553_v38 }
 0x569   :  { %v1670_v47 = vpop.f32.mrf.mxu1 }
 0x56a   :  { %v2555_v51 = vadd.f32 %v1107_v5, %v1051_v43  ;;  %v1671_v63 = vadd.f32 %v1670_v47, %v1669_v41  ;;  %v1155_v28 = vsel %vm142_vm3, %v1149_v60, 0.0 }
 0x56b   :  { %v1672_v27 = vpop.f32.mrf.mxu1 }
 0x56c   :  { %v1150_v54 = vmul.f32 %v2555_v51, %v2555_v51  ;;  %v1056_v62 = vadd.f32 %v1671_v63, %v1002_v61  ;;  %v1128_v47 = vsel %vm142_vm3, %v2555_v51, 0.0 }
 0x56d   :  { %v1673_v58 = vpop.f32.mrf.mxu1 }
 0x56e   :  { %v1156_v7 = vsel %vm142_vm3, %v1150_v54, 0.0  ;;  %v2562_v26 = vadd.f32 %v1112_v14, %v1056_v62  ;;  %v1674_v44 = vadd.f32 %v1673_v58, %v1672_v27  ;;  %v1127_v54 = vsel %vm142_vm3, %v2553_v38, 0.0 }
 0x56f   :  { %v1675_v52 = vpop.f32.mrf.mxu1  ;;  %v1157_v25 = vadd.f32 %v1156_v7, %v1155_v28  ;;  %v1129_v58 = vadd.f32 %v1128_v47, %v1127_v54 }
 0x570   :  { %v1151_v45 = vmul.f32 %v2562_v26, %v2562_v26  ;;  %v1059_v53 = vadd.f32 %v1674_v44, %v1002_v61  ;;  %v1130_v62 = vsel %vm142_vm3, %v2562_v26, 0.0 }
 0x571   :  { %v1676_v56 = vpop.f32.mrf.mxu1  ;;  %v1131_v44 = vadd.f32 %v1130_v62, %v1129_v58 }
 0x572   :  { %v1158_v59 = vsel %vm142_vm3, %v1151_v45, 0.0  ;;  %v1677_v8 = vadd.f32 %v1676_v56, %v1675_v52  ;;  %v2568_v4 = vadd.f32 %v1115_v16, %v1059_v53 }
 0x573   :  { %v1159_v2 = vadd.f32 %v1158_v59, %v1157_v25  ;;  %v1678_v3 = vpop.f32.mrf.mxu1  ;;  %v1132_v28 = vrot.slane %v1131_v44, 4 }
 0x574   :  { %v1064_v6 = vadd.f32 %v1677_v8, %v1002_v61  ;;  %v1152_v11 = vmul.f32 %v2568_v4, %v2568_v4  ;;  %v1138_v63 = vsel %vm142_vm3, %v2568_v4, 0.0 }
 0x575   :  { %v1679_v33 = vpop.f32.mrf.mxu1  ;;  %v1160_v10 = vrot.slane %v1159_v2, 4  ;;  %v1133_v53 = vadd.f32 %v1132_v28, %v1131_v44 }
 0x576   :  { %v2570_v9 = vadd.f32 %v1120_v18, %v1064_v6  ;;  %v1680_v34 = vadd.f32 %v1679_v33, %v1678_v3  ;;  %v1166_v15 = vsel %vm142_vm3, %v1152_v11, 0.0 }
 0x577   :  { %v1161_v14 = vadd.f32 %v1160_v10, %v1159_v2  ;;  %v1134_v56 = vrot.slane %v1133_v53, 2 }
 0x578   :  { %v1153_v32 = vmul.f32 %v2570_v9, %v2570_v9  ;;  %v1067_v12 = vadd.f32 %v1680_v34, %v1002_v61  ;;  %v1139_v43 = vsel %vm142_vm3, %v2570_v9, 0.0 }
 0x579   :  { %v1162_v1 = vrot.slane %v1161_v14, 2  ;;  %v1140_v60 = vadd.f32 %v1139_v43, %v1138_v63  ;;  %v1135_v8 = vadd.f32 %v1134_v56, %v1133_v53 }
 0x57a   :  { %v1167_v5 = vsel %vm142_vm3, %v1153_v32, 0.0  ;;  %v2577_v13 = vadd.f32 %v1123_v20, %v1067_v12  ;;  %v1952_v32 = vld [vmem:[%s2683_s7 + $0x8] sm:$0xff]  ;;  %v1953_v12 = vld [vmem:[%s2683_s7] sm:$0xff] }
 0x57b   :  { %v1168_v17 = vadd.f32 %v1167_v5, %v1166_v15  ;;  %v1163_v19 = vadd.f32 %v1162_v1, %v1161_v14  ;;  %v1136_v3 = vrot.slane %v1135_v8, 1 }
 0x57c   :  { %v1154_v16 = vmul.f32 %v2577_v13, %v2577_v13  ;;  %v1141_v27 = vsel %vm142_vm3, %v2577_v13, 0.0 }
 0x57d   :  { %v1164_v61 = vrot.slane %v1163_v19, 1  ;;  %v1142_v7 = vadd.f32 %v1141_v27, %v1140_v60  ;;  %v1137_v33 = vadd.f32 %v1136_v3, %v1135_v8 }
 0x57e   :  { %v1169_v18 = vsel %vm142_vm3, %v1154_v16, 0.0 }
 0x57f   :  { %v1170_v21 = vadd.f32 %v1169_v18, %v1168_v17  ;;  %v1165_v20 = vadd.f32 %v1164_v61, %v1163_v19  ;;  %v1143_v52 = vrot.slane %v1142_v7, 4 }
 0x581   :  { %v1171_v57 = vrot.slane %v1170_v21, 4  ;;  %v1144_v45 = vadd.f32 %v1143_v52, %v1142_v7 }
 0x583   :  { %v1172_v35 = vadd.f32 %v1171_v57, %v1170_v21  ;;  %v1145_v25 = vrot.slane %v1144_v45, 2 }
 0x585   :  { %v1173_v30 = vrot.slane %v1172_v35, 2  ;;  %v1146_v59 = vadd.f32 %v1145_v25, %v1144_v45 }
 0x587   :  { %v1174_v40 = vadd.f32 %v1173_v30, %v1172_v35  ;;  %v1147_v2 = vrot.slane %v1146_v59, 1 }
 0x589   :  { %v1175_v36 = vrot.slane %v1174_v40, 1  ;;  %v1148_v6 = vadd.f32 %v1147_v2, %v1146_v59 }
 0x58b   :  { %v1176_v39 = vadd.f32 %v1175_v36, %v1174_v40  ;;  %v1179_v10 = vsel %vm195_vm4, %v1148_v6, %v1137_v33 }
 0x58d   :  { %v1183_v41 = vsel %vm195_vm4, %v1176_v39, %v1165_v20 }
 0x58e   :  { %1184 = vrot.lane.b32.xlu1 %v1183_v41, %s1957_s28 }
 0x600   :  { %v1185_v34 = vpop.permute.xlu1 %1184 }
 0x601   :  { %v1187_v11 = vsel %vm142_vm3, %v1179_v10, %v1185_v34 }
 0x602   :  { %1824 = vmatmul.mubr.f32.vlgmr.msra.gmra.mxu0 %v1187_v11 }
 0x603   :  { %1827 = vmatpush3.msra.mxu0 %v1952_v32  ;;  %1830 = vmatprep.mubr.msk.f32.mxu0 %vm1956_vm1, %v1955_v0  ;;  %vm1541_vm1 = vcmask 130112  }
 0x604   :  { %1828 = vmatprep.subr.mxu0 %v1955_v0 }
 0x605   :  { %1829 = vmatpush3.msra.mxu0 %v1953_v12 }
 0x6c2   :  { %v1254_v5 = vpop.f32.mrf.mxu0 }
 0x6c3   :  { %v1258_v14 = vmul.f32 0.0052083335, %v1254_v5 }
 0x6c4   :  { %v1825_v15 = vpop.f32.mrf.mxu0 }
 0x6c5   :  { %v1259_v16 = vmul.f32 %v1258_v14, %v1258_v14 }
 0x6c7   :  { %1261 = vrot.lane.b32.xlu0 %v1259_v16, %s1958_s11 }
 0x739   :  { %v1262_v17 = vpop.permute.xlu0 %1261 }
 0x73a   :  { %v1264_v18 = vsub.f32 %v1258_v14, %v1262_v17 }
 0x73c   :  { %v1265_v21 = vmax.f32 %v1264_v18, 0.0 }
 0x73e   :  { %v1266_v1 = vadd.f32 1e-05, %v1265_v21 }
 0x740   :  { %1926 = vrsqrt.f32 %v1266_v1 }
 0x74d   :  { %v1927_v57 = vpop.eup %1926 }
 0x74e   :  { %v1268_v19 = vsel %vm302_vm5, %v1258_v14, %v1927_v57 }
 0x74f   :  { %1831 = vmatmul.mubr.msk.f32.vlgmr.msra.gmra.mxu0 %vm306_vm6, %v1268_v19 }
 0x80f   :  { %v1338_v0 = vpop.f32.mrf.mxu0 }
 0x810   :  { %v1349_v35 = vrot.slane %v1338_v0, %v2233_v50 }
 0x811   :  { %v1832_v30 = vpop.f32.mrf.mxu0 }
 0x812   :  { %v1350_v61 = vcombine.high %v1349_v35, %v1349_v35  ;;  %v1357_v40 = vrot.slane %v1349_v35, %v2233_v50 }
 0x814   :  { %v1364_v36 = vrot.slane %v1350_v61, %v2233_v50  ;;  %v1368_v20 = vrot.slane %v1357_v40, %v2149_v24 }
 0x816   :  { %v1372_v39 = vrot.slane %v1364_v36, %v2149_v24  ;;  %1381 = vrot.lane.b32.xlu1 %v1368_v20, %s1957_s28  ;;  %v1375_v50 = vsub.f32 %v2553_v38, %v1368_v20 }
 0x818   :  { %1383 = vrot.lane.b32.xlu0 %v1372_v39, %s1957_s28 }
 0x81a   :  { %1394 = vrot.lane.b32.xlu1 %v2308_v42, %s1957_s28  ;;  %v1378_v42 = vsub.f32 %v2568_v4, %v1372_v39 }
 0x81c   :  { %1404 = vrot.lane.b32.xlu0 %v2314_v49, %s1957_s28  ;;  %v1377_v49 = vsub.f32 %v2562_v26, %v1368_v20 }
 0x81e   :  { %1473 = vrot.lane.b32.xlu1 %v2158_v29, %s1957_s28  ;;  %v1376_v29 = vsub.f32 %v2555_v51, %v1368_v20 }
 0x820   :  { %1475 = vrot.lane.b32.xlu0 %v2160_v31, %s1957_s28  ;;  %v1379_v31 = vsub.f32 %v2570_v9, %v1372_v39 }
 0x822   :  { %1479 = vrot.lane.b32.xlu1 %v2173_v46, %s1957_s28  ;;  %v1380_v46 = vsub.f32 %v2577_v13, %v1372_v39 }
 0x824   :  { %1481 = vrot.lane.b32.xlu0 %v2175_v48, %s1957_s28 }
 0x826   :  { %1477 = vrot.lane.b32.xlu1 %v2167_v37, %s1957_s28 }
 0x828   :  { %1483 = vrot.lane.b32.xlu0 %v2182_v55, %s1957_s28 }
 0x888   :  { %v1382_v24 = vpop.permute.xlu1 %1381 }
 0x889   :  { %v1387_v48 = vmul.f32 %v1382_v24, %v1375_v50  ;;  %v1388_v43 = vmul.f32 %v1382_v24, %v1376_v29  ;;  %v1389_v55 = vmul.f32 %v1382_v24, %v1377_v49 }
 0x88a   :  { %v1384_v41 = vpop.permute.xlu0 %1383 }
 0x88b   :  { %v1390_v37 = vmul.f32 %v1384_v41, %v1378_v42  ;;  %v1391_v47 = vmul.f32 %v1384_v41, %v1379_v31  ;;  %v1392_v63 = vmul.f32 %v1384_v41, %v1380_v46 }
 0x88c   :  { %v1395_v27 = vpop.permute.xlu1 %1394 }
 0x88d   :  { %v1397_v60 = vmul.f32 %v1395_v27, %v1387_v48  ;;  %v1398_v38 = vmul.f32 %v1395_v27, %v1388_v43  ;;  %v1400_v54 = vmul.f32 %v1395_v27, %v1390_v37  ;;  %v1401_v51 = vmul.f32 %v1395_v27, %v1391_v47 }
 0x88e   :  { %v1405_v62 = vpop.permute.xlu0 %1404  ;;  %v1399_v4 = vmul.f32 %v1395_v27, %v1389_v55  ;;  %v1402_v58 = vmul.f32 %v1395_v27, %v1392_v63 }
 0x88f   :  { %v1407_v9 = vadd.f32 %v1405_v62, %v1397_v60  ;;  %v1408_v7 = vadd.f32 %v1405_v62, %v1398_v38  ;;  %v1410_v13 = vadd.f32 %v1405_v62, %v1400_v54  ;;  %v2640_v44 = vadd.f32 %v1405_v62, %v1401_v51  ;;  %v1497_v60 = vld [vmem:[%s2687_s8] sm:$0xff] }
 0x890   :  { %v2642_v26 = vadd.f32 %v1405_v62, %v1399_v4  ;;  %v2644_v52 = vadd.f32 %v1405_v62, %v1402_v58  ;;  %v1474_v29 = vpop.permute.xlu1 %1473  ;;  %v1498_v4 = vld [vmem:[%s2687_s8 + $0x8] sm:$0xff] }
 0x891   :  { %v1413_v28 = vmin.f32 %v1407_v9, 20.0  ;;  %v1414_v45 = vmin.f32 %v1408_v7, 20.0  ;;  %v1416_v53 = vmin.f32 %v1410_v13, 20.0  ;;  %v1417_v25 = vmin.f32 %v2640_v44, 20.0 }
 0x892   :  { %v1415_v56 = vmin.f32 %v2642_v26, 20.0  ;;  %v1418_v59 = vmin.f32 %v2644_v52, 20.0  ;;  %v1476_v42 = vpop.permute.xlu0 %1475 }
 0x893   :  { %v1419_v8 = vmul.f32 1.442695, %v1413_v28  ;;  %v1421_v2 = vmul.f32 1.442695, %v1414_v45  ;;  %v1425_v3 = vmul.f32 1.442695, %v1416_v53 }
 0x894   :  { %v1427_v6 = vmul.f32 1.442695, %v1417_v25  ;;  %v1423_v33 = vmul.f32 1.442695, %v1415_v56  ;;  %v1429_v34 = vmul.f32 1.442695, %v1418_v59  ;;  %v1480_v48 = vpop.permute.xlu1 %1479 }
 0x895   :  { %1928 = vpow2.f32 %v1419_v8 }
 0x896   :  { %1930 = vpow2.f32 %v1421_v2  ;;  %v1482_v47 = vpop.permute.xlu0 %1481 }
 0x897   :  { %1932 = vpow2.f32 %v1425_v3 }
 0x898   :  { %1934 = vpow2.f32 %v1427_v6  ;;  %v1478_v56 = vpop.permute.xlu1 %1477 }
 0x899   :  { %1936 = vpow2.f32 %v1423_v33 }
 0x89a   :  { %1938 = vpow2.f32 %v1429_v34  ;;  %v1484_v3 = vpop.permute.xlu0 %1483 }
 0x8a2   :  { %v1929_v10 = vpop.eup %1928 }
 0x8a3   :  { %v1931_v11 = vpop.eup %1930  ;;  %v1431_v32 = vadd.f32 2.0, %v1929_v10 }
 0x8a4   :  { %v1933_v12 = vpop.eup %1932  ;;  %v1432_v5 = vadd.f32 2.0, %v1931_v11 }
 0x8a5   :  { %v1935_v14 = vpop.eup %1934  ;;  %v1437_v15 = vmul.f32 %v1929_v10, %v1431_v32  ;;  %v1434_v16 = vadd.f32 2.0, %v1933_v12 }
 0x8a6   :  { %v1937_v17 = vpop.eup %1936  ;;  %v1438_v18 = vmul.f32 %v1931_v11, %v1432_v5  ;;  %v1435_v21 = vadd.f32 2.0, %v1935_v14 }
 0x8a7   :  { %v1939_v1 = vpop.eup %1938  ;;  %v1449_v57 = vadd.f32 2.0, %v1437_v15  ;;  %v1440_v19 = vmul.f32 %v1933_v12, %v1434_v16  ;;  %v1433_v0 = vadd.f32 2.0, %v1937_v17  ;;  %v1443_v31 = vmul.f32 %v1437_v15, %v1407_v9 }
 0x8a8   :  { %v1450_v35 = vadd.f32 2.0, %v1438_v18  ;;  %v1441_v30 = vmul.f32 %v1935_v14, %v1435_v21  ;;  %v1436_v61 = vadd.f32 2.0, %v1939_v1  ;;  %v1444_v49 = vmul.f32 %v1438_v18, %v1408_v7 }
 0x8a9   :  { %1940 = vrcp.f32 %v1449_v57  ;;  %v1452_v40 = vadd.f32 2.0, %v1440_v19  ;;  %v1439_v36 = vmul.f32 %v1937_v17, %v1433_v0  ;;  %v1446_v37 = vmul.f32 %v1440_v19, %v1410_v13 }
 0x8aa   :  { %1942 = vrcp.f32 %v1450_v35  ;;  %v1453_v20 = vadd.f32 2.0, %v1441_v30  ;;  %v1442_v39 = vmul.f32 %v1939_v1, %v1436_v61  ;;  %v1447_v27 = vmul.f32 %v1441_v30, %v2640_v44 }
 0x8ab   :  { %1944 = vrcp.f32 %v1452_v40  ;;  %v1451_v24 = vadd.f32 2.0, %v1439_v36  ;;  %v1445_v62 = vmul.f32 %v1439_v36, %v2642_v26  ;;  %v1531_v16 = vand.u32 127, %v43_v22 }
 0x8ac   :  { %1946 = vrcp.f32 %v1453_v20  ;;  %v1454_v50 = vadd.f32 2.0, %v1442_v39  ;;  %v1448_v13 = vmul.f32 %v1442_v39, %v2644_v52  ;;  %v1499_v52 = vld [vmem:[%s2687_s8 + $0x10] sm:$0xff] }
 0x8ad   :  { %1948 = vrcp.f32 %v1451_v24  ;;  %v1536_v17 = vadd.s32 4294967288, %v1531_v16  ;;  %v1543_v1 = vadd.s32 4294967280, %v1531_v16  ;;  %v1534_v57 = vsub.s32 %v1531_v16, %v2146_v23 }
 0x8ae   :  { %1950 = vrcp.f32 %v1454_v50 }
 0x8af   :  { %v1539_v19 = vsub.s32 %v1536_v17, %v2146_v23  ;;  %v1546_v30 = vsub.s32 %v1543_v1, %v2146_v23 }
 0x8b6   :  { %v1941_v46 = vpop.eup %1940 }
 0x8b7   :  { %v1943_v41 = vpop.eup %1942  ;;  %v1461_v43 = vmul.f32 %v1941_v46, %v1443_v31 }
 0x8b8   :  { %v1945_v63 = vpop.eup %1944  ;;  %v1462_v55 = vmul.f32 %v1943_v41, %v1444_v49  ;;  %v1960_v41 = vmov 0  }
 0x8b9   :  { %v1947_v38 = vpop.eup %1946  ;;  %v1491_v54 = vadd.f32 %v1474_v29, %v1461_v43  ;;  %v1464_v51 = vmul.f32 %v1945_v63, %v1446_v37  ;;  %1869 = vset.pattern.permute.xlu1 %v1960_v41  ;;  %1870 = vset.pattern.permute.xlu0 %v1960_v41  ;;  %v1572_v43 = vsub.s32 4, %v2146_v23  ;;  %v1954_v37 = vld [vmem:[%s2682_s5] sm:$0xff] }
 0x8ba   :  { %v1949_v58 = vpop.eup %1948  ;;  %v1492_v9 = vadd.f32 %v1476_v42, %v1462_v55  ;;  %v1465_v7 = vmul.f32 %v1947_v38, %v1447_v27 }
 0x8bb   :  { %v1951_v28 = vpop.eup %1950  ;;  %v1494_v44 = vadd.f32 %v1480_v48, %v1464_v51  ;;  %v1463_v45 = vmul.f32 %v1949_v58, %v1445_v62  ;;  %v1500_v53 = vmul.f32 %v1497_v60, %v1491_v54 }
 0x8bc   :  { %v1495_v25 = vadd.f32 %v1482_v47, %v1465_v7  ;;  %v1466_v59 = vmul.f32 %v1951_v28, %v1448_v13  ;;  %v1501_v8 = vmul.f32 %v1498_v4, %v1492_v9  ;;  %v1573_v47 = vrot.slane %v1954_v37, %v1572_v43 }
 0x8bd   :  { %v1493_v2 = vadd.f32 %v1478_v56, %v1463_v45  ;;  %v1506_v26 = vsel %vm142_vm3, %v1500_v53, 0.0  ;;  %v1503_v10 = vmul.f32 %v1497_v60, %v1494_v44 }
 0x8be   :  { %v1496_v6 = vadd.f32 %v1484_v3, %v1466_v59  ;;  %1507 = vadd.xlane.f32.xlu1 %v1506_v26  ;;  %v1509_v33 = vsel %vm142_vm3, %v1501_v8, 0.0  ;;  %v1504_v34 = vmul.f32 %v1498_v4, %v1495_v25 }
 0x8bf   :  { %1510 = vadd.xlane.f32.xlu0 %v1509_v33  ;;  %v1515_v12 = vsel %vm142_vm3, %v1503_v10, 0.0  ;;  %v1502_v5 = vmul.f32 %v1499_v52, %v1493_v2 }
 0x8c0   :  { %v1518_v11 = vsel %vm142_vm3, %v1504_v34, 0.0  ;;  %v1505_v32 = vmul.f32 %v1499_v52, %v1496_v6 }
 0x8c1   :  { %v1512_v15 = vsel %vm142_vm3, %v1502_v5, 0.0 }
 0x8c2   :  { %1519 = vadd.xlane.f32.xlu1 %v1518_v11  ;;  %v1521_v14 = vsel %vm142_vm3, %v1505_v32, 0.0  ;;  %vm1566_vm3 = vcmask 189440  }
 0x8c3   :  { %1516 = vadd.xlane.f32.xlu0 %v1515_v12 }
 0x8c6   :  { %1522 = vadd.xlane.f32.xlu1 %v1521_v14 }
 0x8c7   :  { %1513 = vadd.xlane.f32.xlu0 %v1512_v15 }
 0x947   :  { %v1508_v18 = vpop.xlane.xlu1 %1507 }
 0x948   :  { %v1511_v21 = vpop.xlane.xlu0 %1510  ;;  %v1535_v36 = vrot.slane %v1508_v18, %v1534_v57 }
 0x949   :  { %v1540_v20 = vrot.slane %v1511_v21, %v1539_v19 }
 0x94b   :  { %v1520_v0 = vpop.xlane.xlu1 %1519  ;;  %v1542_v42 = vsel %vm1541_vm1, %v1540_v20, %v1535_v36 }
 0x94c   :  { %v1517_v35 = vpop.xlane.xlu0 %1516  ;;  %v1557_v61 = vrot.slane %v1520_v0, %v1539_v19 }
 0x94d   :  { %v1553_v40 = vrot.slane %v1517_v35, %v1534_v57 }
 0x94f   :  { %v1523_v39 = vpop.xlane.xlu1 %1522  ;;  %v1558_v50 = vsel %vm1541_vm1, %v1557_v61, %v1553_v40 }
 0x950   :  { %v1562_v22 = vrot.slane %v1523_v39, %v1546_v30  ;;  %v1514_v24 = vpop.xlane.xlu0 %1513 }
 0x951   :  { %v1547_v29 = vrot.slane %v1514_v24, %v1546_v30 }
 0x952   :  { %v1563_v31 = vsel %vm1548_vm2, %v1562_v22, %v1558_v50 }
 0x953   :  { %v1549_v46 = vsel %vm1548_vm2, %v1547_v29, %v1542_v42 }
 0x954   :  { %v1564_v49 = vsel %vm195_vm4, %v1563_v31, %v1549_v46 }
 0x955   :  { %v1567_v48 = vsel %vm1566_vm3, %v1564_v49, 0.0 }
 0x956   :  { %1568 = vadd.xlane.f32.xlu0 %v1567_v48 }
 0x9df   :  { %v1569_v63 = vpop.xlane.xlu0 %1568 }
 0x9e0   :  { %v1574_v55 = vadd.f32 %v1573_v47, %v1569_v63 }
 0x9e2   :  { %1577 = vperm.xlu1 %1869, %v1574_v55  }
 0xa5d   :  { %v1578_v27 = vpop.permute.xlu1 %1577 }
 0xa5e   :  { %1580 = vst [vmem:[%s2688_s9] sm:$0x3] %v1578_v27 }

</bundles_post_ra>
